<compile_context>
chip_gen: v7x
topology: tpu7x:2x2x1
jax: 0.10.0
libtpu: 0.0.40
codegen_flags: <defaults>
</compile_context>

<pallas_src>
import functools

import jax
import jax.numpy as jnp
from jax import lax
from jax.experimental import pallas as pl
from jax.experimental.pallas import tpu as pltpu

LANE = 128
_VMEM_LIMIT = 64 * 1024 * 1024


# -----------------------------------------------------------------------------
# Helpers
# -----------------------------------------------------------------------------
def _round_up(x, m):
    return (x + m - 1) // m * m


def _pad2d(x, rows, cols):
    r, c = x.shape
    if r == rows and c == cols:
        return x
    return jnp.pad(x, ((0, rows - r), (0, cols - c)))


def fold_norms(adj, in_norm, out_norm):
    # A_norm = diag(out_norm) @ A @ diag(in_norm) -- computed once, reused by
    # every GCN layer, so the kernels never touch the degree vectors.
    return adj * in_norm.reshape(1, -1) * out_norm.reshape(-1, 1)


def _ln_relu_epilogue(z, gamma, beta, f_out):
    # LayerNorm over the TRUE feature width (padded cols of z are exactly 0,
    # so sum(z)/f_out and sum(z*z)/f_out are correct); gamma/beta are
    # zero-padded so padded output columns stay exactly 0.  f32 statistics.
    inv_f = 1.0 / float(f_out)
    mean = jnp.sum(z, axis=-1, keepdims=True) * inv_f
    ex2 = jnp.sum(z * z, axis=-1, keepdims=True) * inv_f
    var = ex2 - mean * mean
    y = (z - mean) * lax.rsqrt(var + 1e-5)
    y = y * gamma + beta
    return jnp.maximum(y, 0.0)  # ReLU activation


# -----------------------------------------------------------------------------
# Kernels
# -----------------------------------------------------------------------------
def _gcn_layer_kernel(*refs, f_out, apply_ln_relu):
    # grid = (row_tiles, k_tiles); k is the aggregation (neighbour) dimension.
    if apply_ln_relu:
        a_ref, h_ref, w_ref, b_ref, gamma_ref, beta_ref, o_ref, acc_ref = refs
    else:
        a_ref, h_ref, w_ref, b_ref, o_ref, acc_ref = refs
        gamma_ref = beta_ref = None

    k = pl.program_id(1)

    @pl.when(k == 0)
    def _():
        acc_ref[...] = jnp.zeros_like(acc_ref)

    # bf16 x bf16 MXU matmul, f32 accumulation (degree norms already folded
    # into the adjacency).
    acc_ref[...] += jnp.dot(a_ref[...], h_ref[...],
                            preferred_element_type=jnp.float32)

    @pl.when(k == pl.num_programs(1) - 1)
    def _():
        # Projection on the bf16 MXU path, bias (+ fused LayerNorm/ReLU
        # epilogue) in f32.
        z = jnp.dot(acc_ref[...].astype(jnp.bfloat16), w_ref[...],
                    preferred_element_type=jnp.float32)
        z = z + b_ref[...]
        if apply_ln_relu:
            z = _ln_relu_epilogue(z, gamma_ref[...], beta_ref[...], f_out)
        o_ref[...] = z.astype(o_ref.dtype)


def _linear_kernel(*refs, f_out, apply_ln_relu):
    if apply_ln_relu:
        x_ref, w_ref, b_ref, gamma_ref, beta_ref, o_ref = refs
    else:
        x_ref, w_ref, b_ref, o_ref = refs
        gamma_ref = beta_ref = None

    z = jnp.dot(x_ref[...].astype(jnp.bfloat16), w_ref[...],
                preferred_element_type=jnp.float32)
    z = z + b_ref[...]
    if apply_ln_relu:
        z = _ln_relu_epilogue(z, gamma_ref[...], beta_ref[...], f_out)
    o_ref[...] = z.astype(o_ref.dtype)


# -----------------------------------------------------------------------------
# Wrappers
# -----------------------------------------------------------------------------
def gcn_layer(a_norm, h, w, b, gamma, beta, *, f_out_true, apply_ln_relu,
              out_dtype, tile_m=128, tile_k=128):
    n = a_norm.shape[0]
    f_in_p = h.shape[1]
    f_out_p = w.shape[1]
    assert n % tile_m == 0 and n % tile_k == 0

    in_specs = [
        pl.BlockSpec((tile_m, tile_k), lambda i, k: (i, k)),   # A_norm tile
        pl.BlockSpec((tile_k, f_in_p), lambda i, k: (k, 0)),   # H k-slice
        pl.BlockSpec((f_in_p, f_out_p), lambda i, k: (0, 0)),  # W (resident)
        pl.BlockSpec((1, f_out_p), lambda i, k: (0, 0)),       # bias
    ]
    args = [a_norm, h, w, b]
    if apply_ln_relu:
        in_specs += [pl.BlockSpec((1, f_out_p), lambda i, k: (0, 0)),   # gamma
                     pl.BlockSpec((1, f_out_p), lambda i, k: (0, 0))]   # beta
        args += [gamma, beta]

    kernel = functools.partial(_gcn_layer_kernel, f_out=f_out_true,
                               apply_ln_relu=apply_ln_relu)
    return pl.pallas_call(
        kernel,
        out_shape=jax.ShapeDtypeStruct((n, f_out_p), out_dtype),
        grid_spec=pltpu.PrefetchScalarGridSpec(
            num_scalar_prefetch=0,
            grid=(n // tile_m, n // tile_k),
            in_specs=in_specs,
            out_specs=pl.BlockSpec((tile_m, f_out_p), lambda i, k: (i, 0)),
            scratch_shapes=[pltpu.VMEM((tile_m, f_in_p), jnp.float32)],
        ),
        compiler_params=pltpu.CompilerParams(
            dimension_semantics=("parallel", "arbitrary"),
            vmem_limit_bytes=_VMEM_LIMIT),
    )(*args)


def linear_layer(x, w, b, gamma, beta, *, f_out_true, apply_ln_relu,
                 out_dtype, tile_m=128):
    n, f_in_p = x.shape
    f_out_p = w.shape[1]
    assert n % tile_m == 0

    in_specs = [
        pl.BlockSpec((tile_m, f_in_p), lambda i: (i, 0)),
        pl.BlockSpec((f_in_p, f_out_p), lambda i: (0, 0)),
        pl.BlockSpec((1, f_out_p), lambda i: (0, 0)),
    ]
    args = [x, w, b]
    if apply_ln_relu:
        in_specs += [pl.BlockSpec((1, f_out_p), lambda i: (0, 0)),
                     pl.BlockSpec((1, f_out_p), lambda i: (0, 0))]
        args += [gamma, beta]

    kernel = functools.partial(_linear_kernel, f_out=f_out_true,
                               apply_ln_relu=apply_ln_relu)
    return pl.pallas_call(
        kernel,
        out_shape=jax.ShapeDtypeStruct((n, f_out_p), out_dtype),
        grid_spec=pltpu.PrefetchScalarGridSpec(
            num_scalar_prefetch=0,
            grid=(n // tile_m,),
            in_specs=in_specs,
            out_specs=pl.BlockSpec((tile_m, f_out_p), lambda i: (i, 0)),
        ),
        compiler_params=pltpu.CompilerParams(
            dimension_semantics=("parallel",),
            vmem_limit_bytes=_VMEM_LIMIT),
    )(*args)


# -----------------------------------------------------------------------------
# GCN model (eval-mode forward, activation = ReLU, norm = 'layer')
# -----------------------------------------------------------------------------
def init_gcn_params(key, layer_size):
    n_layers = len(layer_size) - 1
    params = {"layers": [], "norm": []}
    keys = jax.random.split(key, 2 * n_layers)
    for i in range(n_layers):
        f_in, f_out = layer_size[i], layer_size[i + 1]
        scale = 1.0 / float(f_in) ** 0.5
        w = jax.random.uniform(keys[2 * i], (f_in, f_out),
                               minval=-scale, maxval=scale, dtype=jnp.float32)
        b = jax.random.uniform(keys[2 * i + 1], (f_out,),
                               minval=-scale, maxval=scale, dtype=jnp.float32)
        params["layers"].append({"w": w, "b": b})
        if i < n_layers - 1:
            # nn.LayerNorm(elementwise_affine=True) default: gamma=1, beta=0
            params["norm"].append({"gamma": jnp.ones((f_out,), jnp.float32),
                                   "beta": jnp.zeros((f_out,), jnp.float32)})
    return params


def gcn_forward(params, adj, feat, in_norm, out_norm, *, layer_size, n_linear,
                tile_m=128, tile_k=128):
    n = adj.shape[0]
    n_layers = len(layer_size) - 1
    n_pad = _round_up(n, max(tile_m, tile_k))

    # Fold degree norms into the adjacency once; bf16 for the MXU.
    a_norm = _pad2d(fold_norms(adj, in_norm, out_norm),
                    n_pad, n_pad).astype(jnp.bfloat16)
    h = _pad2d(feat, n_pad, _round_up(layer_size[0], LANE)).astype(jnp.bfloat16)

    for i in range(n_layers):
        # TODO(synk): self.dropout(h) and ctx.buffer.update() are identity in
        #             eval mode (no Pallas equivalent implemented).
        f_in, f_out = layer_size[i], layer_size[i + 1]
        f_in_p, f_out_p = _round_up(f_in, LANE), _round_up(f_out, LANE)
        # Weights on the bf16 MXU path; bias / LN params stay f32.
        w = _pad2d(params["layers"][i]["w"], f_in_p, f_out_p).astype(jnp.bfloat16)
        b = _pad2d(params["layers"][i]["b"].reshape(1, -1), 1, f_out_p)

        is_last = (i == n_layers - 1)
        apply_ln_relu = not is_last
        if apply_ln_relu:
            gamma = _pad2d(params["norm"][i]["gamma"].reshape(1, -1), 1, f_out_p)
            beta = _pad2d(params["norm"][i]["beta"].reshape(1, -1), 1, f_out_p)
        else:
            gamma = beta = None
        out_dtype = jnp.float32 if is_last else jnp.bfloat16

        if i < n_layers - n_linear:
            h = gcn_layer(a_norm, h, w, b, gamma, beta, f_out_true=f_out,
                          apply_ln_relu=apply_ln_relu, out_dtype=out_dtype,
                          tile_m=tile_m, tile_k=tile_k)
        else:
            h = linear_layer(h, w, b, gamma, beta, f_out_true=f_out,
                             apply_ln_relu=apply_ln_relu, out_dtype=out_dtype,
                             tile_m=tile_m)
    return h[:n, :layer_size[-1]]


# -----------------------------------------------------------------------------
# Pure-JAX reference (same bf16 cast points as the kernels)
# -----------------------------------------------------------------------------
def reference_forward(params, adj, feat, in_norm, out_norm, *, layer_size,
                      n_linear):
    a_norm = fold_norms(adj, in_norm, out_norm).astype(jnp.bfloat16)
    h = feat.astype(jnp.bfloat16)
    n_layers = len(layer_size) - 1
    for i in range(n_layers):
        w = params["layers"][i]["w"].astype(jnp.bfloat16)
        b = params["layers"][i]["b"]
        if i < n_layers - n_linear:
            agg = jnp.dot(a_norm, h, preferred_element_type=jnp.float32)
            z = jnp.dot(agg.astype(jnp.bfloat16), w,
                        preferred_element_type=jnp.float32) + b
        else:
            z = jnp.dot(h.astype(jnp.bfloat16), w,
                        preferred_element_type=jnp.float32) + b
        if i < n_layers - 1:
            gamma = params["norm"][i]["gamma"]
            beta = params["norm"][i]["beta"]
            mean = jnp.mean(z, axis=-1, keepdims=True)
            ex2 = jnp.mean(z * z, axis=-1, keepdims=True)
            var = ex2 - mean * mean
            y = (z - mean) * lax.rsqrt(var + 1e-5) * gamma + beta
            h = jnp.maximum(y, 0.0).astype(jnp.bfloat16)
        else:
            h = z
    return h


# -----------------------------------------------------------------------------
if __name__ == "__main__":
    N = 256                       # number of graph nodes (2 row tiles -> both TCs on v7x)
    layer_size = [32, 64, 64, 16]
    n_linear = 1                  # last layer is nn.Linear, first two are GCNLayer

    key = jax.random.PRNGKey(0)
    k_adj, k_feat, k_param = jax.random.split(key, 3)

    # Dense synthetic graph with self loops; symmetric degree normalization.
    a = (jax.random.uniform(k_adj, (N, N)) < 0.05).astype(jnp.float32)
    a = jnp.maximum(a, a.T)
    a = jnp.minimum(a + jnp.eye(N, dtype=jnp.float32), 1.0)
    deg = jnp.sum(a, axis=1)
    d_inv_sqrt = 1.0 / jnp.sqrt(deg)
    in_norm = d_inv_sqrt
    out_norm = d_inv_sqrt

    feat = jax.random.normal(k_feat, (N, layer_size[0]), dtype=jnp.float32)
    params = init_gcn_params(k_param, layer_size)

    fwd = jax.jit(functools.partial(gcn_forward, layer_size=tuple(layer_size),
                                    n_linear=n_linear))
    out = fwd(params, a, feat, in_norm, out_norm)
    jax.block_until_ready(out)

    ref = reference_forward(params, a, feat, in_norm, out_norm,
                            layer_size=layer_size, n_linear=n_linear)

    assert out.shape == (N, layer_size[-1])
    assert jnp.all(jnp.isfinite(out))
    max_err = float(jnp.max(jnp.abs(out - ref)))
    scale = float(jnp.max(jnp.abs(ref))) + 1e-6
    assert max_err <= 5e-2 * scale + 5e-3, (max_err, scale)
    print("KERNEL_OK")
</pallas_src>

<mosaic_0001>
module attributes {stable_mosaic.version = 11 : i64} {
  func.func @_gcn_layer_kernel(%arg0: i32, %arg1: i32, %arg2: memref<128x128xbf16, #tpu.memory_space<vmem>>, %arg3: memref<128x128xbf16, #tpu.memory_space<vmem>>, %arg4: memref<128x128xbf16, #tpu.memory_space<vmem>>, %arg5: memref<1x128xf32, #tpu.memory_space<vmem>>, %arg6: memref<1x128xf32, #tpu.memory_space<vmem>>, %arg7: memref<1x128xf32, #tpu.memory_space<vmem>>, %arg8: memref<128x128xbf16, #tpu.memory_space<vmem>>, %arg9: memref<128x128xf32, #tpu.memory_space<vmem>>) attributes {dimension_semantics = [#tpu.dimension_semantics<parallel>, #tpu.dimension_semantics<arbitrary>], iteration_bounds = array<i64: 2, 2>, scalar_prefetch = 0 : i64, scratch_operands = 1 : i64, tpu.core_type = #tpu.core_type<tc>, window_params = [{transform_indices = @transform_0, window_bounds = array<i64: 128, 128>}, {transform_indices = @transform_1, window_bounds = array<i64: 128, 128>}, {pipeline_mode = #tpu.pipeline_mode<synchronous>, transform_indices = @transform_2, window_bounds = array<i64: 128, 128>}, {pipeline_mode = #tpu.pipeline_mode<synchronous>, transform_indices = @transform_3, window_bounds = array<i64: 1, 128>}, {pipeline_mode = #tpu.pipeline_mode<synchronous>, transform_indices = @transform_4, window_bounds = array<i64: 1, 128>}, {pipeline_mode = #tpu.pipeline_mode<synchronous>, transform_indices = @transform_5, window_bounds = array<i64: 1, 128>}, {transform_indices = @transform_6, window_bounds = array<i64: 128, 128>}]} {
    %c0_i32 = arith.constant 0 : i32
    %0 = arith.cmpi eq, %arg1, %c0_i32 : i32
    %1 = arith.extui %0 : i1 to i32
    %c0_i32_0 = arith.constant 0 : i32
    %2 = arith.cmpi ne, %1, %c0_i32_0 : i32
    scf.if %2 {
      %cst_9 = arith.constant 0.000000e+00 : f32
      %12 = vector.broadcast %cst_9 : f32 to vector<128x128xf32>
      %c0_10 = arith.constant 0 : index
      %c0_11 = arith.constant 0 : index
      %13 = vector.load %arg9[%c0_10, %c0_11] : memref<128x128xf32, #tpu.memory_space<vmem>>, vector<128x128xf32>
      tpu.vector_store %arg9[%c0_10, %c0_11], %12 {strides = array<i32>} : memref<128x128xf32, #tpu.memory_space<vmem>>, vector<128x128xf32>,
    } else {
    }
    %c0 = arith.constant 0 : index
    %c0_1 = arith.constant 0 : index
    %3 = vector.load %arg9[%c0, %c0_1] : memref<128x128xf32, #tpu.memory_space<vmem>>, vector<128x128xf32>
    %c0_2 = arith.constant 0 : index
    %c0_3 = arith.constant 0 : index
    %4 = vector.load %arg2[%c0_2, %c0_3] : memref<128x128xbf16, #tpu.memory_space<vmem>>, vector<128x128xbf16>
    %c0_4 = arith.constant 0 : index
    %c0_5 = arith.constant 0 : index
    %5 = vector.load %arg3[%c0_4, %c0_5] : memref<128x128xbf16, #tpu.memory_space<vmem>>, vector<128x128xbf16>
    %cst = arith.constant dense<0.000000e+00> : vector<128x128xf32>
    %6 = tpu.matmul %4, %5, %cst {dimension_numbers = #tpu.dot_dimension_numbers<[1], [0], [0], [1], [0, 0, 1, 1], [], []>} : vector<128x128xbf16>, vector<128x128xbf16>, vector<128x128xf32> -> vector<128x128xf32>
    %7 = arith.addf %3, %6 : vector<128x128xf32>
    %c0_6 = arith.constant 0 : index
    %c0_7 = arith.constant 0 : index
    %8 = vector.load %arg9[%c0_6, %c0_7] : memref<128x128xf32, #tpu.memory_space<vmem>>, vector<128x128xf32>
    tpu.vector_store %arg9[%c0_6, %c0_7], %7 {strides = array<i32>} : memref<128x128xf32, #tpu.memory_space<vmem>>, vector<128x128xf32>,
    %c1_i32 = arith.constant 1 : i32
    %9 = arith.cmpi eq, %arg1, %c1_i32 : i32
    %10 = arith.extui %9 : i1 to i32
    %c0_i32_8 = arith.constant 0 : i32
    %11 = arith.cmpi ne, %10, %c0_i32_8 : i32
    scf.if %11 {
      %c0_9 = arith.constant 0 : index
      %c0_10 = arith.constant 0 : index
      %12 = vector.load %arg9[%c0_9, %c0_10] : memref<128x128xf32, #tpu.memory_space<vmem>>, vector<128x128xf32>
      %13 = arith.truncf %12 : vector<128x128xf32> to vector<128x128xbf16>
      %c0_11 = arith.constant 0 : index
      %c0_12 = arith.constant 0 : index
      %14 = vector.load %arg4[%c0_11, %c0_12] : memref<128x128xbf16, #tpu.memory_space<vmem>>, vector<128x128xbf16>
      %cst_13 = arith.constant dense<0.000000e+00> : vector<128x128xf32>
      %15 = tpu.matmul %13, %14, %cst_13 {dimension_numbers = #tpu.dot_dimension_numbers<[1], [0], [0], [1], [0, 0, 1, 1], [], []>} : vector<128x128xbf16>, vector<128x128xbf16>, vector<128x128xf32> -> vector<128x128xf32>
      %c0_14 = arith.constant 0 : index
      %c0_15 = arith.constant 0 : index
      %16 = vector.load %arg5[%c0_14, %c0_15] : memref<1x128xf32, #tpu.memory_space<vmem>>, vector<1x128xf32>
      %17 = vector.broadcast %16 : vector<1x128xf32> to vector<128x128xf32>
      %18 = arith.addf %15, %17 : vector<128x128xf32>
      %c0_16 = arith.constant 0 : index
      %c0_17 = arith.constant 0 : index
      %19 = vector.load %arg6[%c0_16, %c0_17] : memref<1x128xf32, #tpu.memory_space<vmem>>, vector<1x128xf32>
      %c0_18 = arith.constant 0 : index
      %c0_19 = arith.constant 0 : index
      %20 = vector.load %arg7[%c0_18, %c0_19] : memref<1x128xf32, #tpu.memory_space<vmem>>, vector<1x128xf32>
      %cst_20 = arith.constant dense<0.000000e+00> : vector<128xf32>
      %21 = vector.multi_reduction <add>, %18, %cst_20 [1] : vector<128x128xf32> to vector<128xf32>
      %22 = vector.shape_cast %21 : vector<128xf32> to vector<128x1xf32>
      %cst_21 = arith.constant 1.562500e-02 : f32
      %23 = vector.broadcast %cst_21 : f32 to vector<128x1xf32>
      %24 = arith.mulf %22, %23 : vector<128x1xf32>
      %25 = arith.mulf %18, %18 : vector<128x128xf32>
      %cst_22 = arith.constant dense<0.000000e+00> : vector<128xf32>
      %26 = vector.multi_reduction <add>, %25, %cst_22 [1] : vector<128x128xf32> to vector<128xf32>
      %27 = vector.shape_cast %26 : vector<128xf32> to vector<128x1xf32>
      %cst_23 = arith.constant 1.562500e-02 : f32
      %28 = vector.broadcast %cst_23 : f32 to vector<128x1xf32>
      %29 = arith.mulf %27, %28 : vector<128x1xf32>
      %30 = arith.mulf %24, %24 : vector<128x1xf32>
      %31 = arith.subf %29, %30 : vector<128x1xf32>
      %32 = vector.broadcast %24 : vector<128x1xf32> to vector<128x128xf32>
      %33 = arith.subf %18, %32 : vector<128x128xf32>
      %cst_24 = arith.constant 9.99999974E-6 : f32
      %34 = vector.broadcast %cst_24 : f32 to vector<128x1xf32>
      %35 = arith.addf %31, %34 : vector<128x1xf32>
      %36 = math.rsqrt %35 : vector<128x1xf32>
      %37 = vector.broadcast %36 : vector<128x1xf32> to vector<128x128xf32>
      %38 = arith.mulf %33, %37 : vector<128x128xf32>
      %39 = vector.broadcast %19 : vector<1x128xf32> to vector<128x128xf32>
      %40 = arith.mulf %38, %39 : vector<128x128xf32>
      %41 = vector.broadcast %20 : vector<1x128xf32> to vector<128x128xf32>
      %42 = arith.addf %40, %41 : vector<128x128xf32>
      %cst_25 = arith.constant 0.000000e+00 : f32
      %43 = vector.broadcast %cst_25 : f32 to vector<128x128xf32>
      %44 = arith.maximumf %42, %43 : vector<128x128xf32>
      %45 = arith.truncf %44 : vector<128x128xf32> to vector<128x128xbf16>
      %c0_26 = arith.constant 0 : index
      %c0_27 = arith.constant 0 : index
      %46 = vector.load %arg8[%c0_26, %c0_27] : memref<128x128xbf16, #tpu.memory_space<vmem>>, vector<128x128xbf16>
      tpu.vector_store %arg8[%c0_26, %c0_27], %45 {strides = array<i32>} : memref<128x128xbf16, #tpu.memory_space<vmem>>, vector<128x128xbf16>,
    } else {
    }
    return
  }
  func.func @transform_0(%arg0: i32, %arg1: i32) -> (i32, i32) {
    %c0_i32 = arith.constant 0 : i32
    return %arg0, %arg1 : i32, i32
  }
  func.func @transform_1(%arg0: i32, %arg1: i32) -> (i32, i32) {
    %c0_i32 = arith.constant 0 : i32
    %c0_i32_0 = arith.constant 0 : i32
    return %arg1, %c0_i32 : i32, i32
  }
  func.func @transform_2(%arg0: i32, %arg1: i32) -> (i32, i32) {
    %c0_i32 = arith.constant 0 : i32
    %c0_i32_0 = arith.constant 0 : i32
    %c0_i32_1 = arith.constant 0 : i32
    return %c0_i32, %c0_i32_0 : i32, i32
  }
  func.func @transform_3(%arg0: i32, %arg1: i32) -> (i32, i32) {
    %c0_i32 = arith.constant 0 : i32
    %c0_i32_0 = arith.constant 0 : i32
    %c0_i32_1 = arith.constant 0 : i32
    return %c0_i32, %c0_i32_0 : i32, i32
  }
  func.func @transform_4(%arg0: i32, %arg1: i32) -> (i32, i32) {
    %c0_i32 = arith.constant 0 : i32
    %c0_i32_0 = arith.constant 0 : i32
    %c0_i32_1 = arith.constant 0 : i32
    return %c0_i32, %c0_i32_0 : i32, i32
  }
  func.func @transform_5(%arg0: i32, %arg1: i32) -> (i32, i32) {
    %c0_i32 = arith.constant 0 : i32
    %c0_i32_0 = arith.constant 0 : i32
    %c0_i32_1 = arith.constant 0 : i32
    return %c0_i32, %c0_i32_0 : i32, i32
  }
  func.func @transform_6(%arg0: i32, %arg1: i32) -> (i32, i32) {
    %c0_i32 = arith.constant 0 : i32
    %c0_i32_0 = arith.constant 0 : i32
    return %arg0, %c0_i32 : i32, i32
  }
}

module attributes {stable_mosaic.version = 11 : i64} {
  func.func @_linear_kernel(%arg0: i32, %arg1: memref<128x128xbf16, #tpu.memory_space<vmem>>, %arg2: memref<128x128xbf16, #tpu.memory_space<vmem>>, %arg3: memref<1x128xf32, #tpu.memory_space<vmem>>, %arg4: memref<128x128xf32, #tpu.memory_space<vmem>>) attributes {dimension_semantics = [#tpu.dimension_semantics<parallel>], iteration_bounds = array<i64: 2>, scalar_prefetch = 0 : i64, scratch_operands = 0 : i64, tpu.core_type = #tpu.core_type<tc>, window_params = [{transform_indices = @transform_0, window_bounds = array<i64: 128, 128>}, {pipeline_mode = #tpu.pipeline_mode<synchronous>, transform_indices = @transform_1, window_bounds = array<i64: 128, 128>}, {pipeline_mode = #tpu.pipeline_mode<synchronous>, transform_indices = @transform_2, window_bounds = array<i64: 1, 128>}, {transform_indices = @transform_3, window_bounds = array<i64: 128, 128>}]} {
    %c0 = arith.constant 0 : index
    %c0_0 = arith.constant 0 : index
    %0 = vector.load %arg1[%c0, %c0_0] : memref<128x128xbf16, #tpu.memory_space<vmem>>, vector<128x128xbf16>
    %c0_1 = arith.constant 0 : index
    %c0_2 = arith.constant 0 : index
    %1 = vector.load %arg2[%c0_1, %c0_2] : memref<128x128xbf16, #tpu.memory_space<vmem>>, vector<128x128xbf16>
    %cst = arith.constant dense<0.000000e+00> : vector<128x128xf32>
    %2 = tpu.matmul %0, %1, %cst {dimension_numbers = #tpu.dot_dimension_numbers<[1], [0], [0], [1], [0, 0, 1, 1], [], []>} : vector<128x128xbf16>, vector<128x128xbf16>, vector<128x128xf32> -> vector<128x128xf32>
    %c0_3 = arith.constant 0 : index
    %c0_4 = arith.constant 0 : index
    %3 = vector.load %arg3[%c0_3, %c0_4] : memref<1x128xf32, #tpu.memory_space<vmem>>, vector<1x128xf32>
    %4 = vector.broadcast %3 : vector<1x128xf32> to vector<128x128xf32>
    %5 = arith.addf %2, %4 : vector<128x128xf32>
    %c0_5 = arith.constant 0 : index
    %c0_6 = arith.constant 0 : index
    %6 = vector.load %arg4[%c0_5, %c0_6] : memref<128x128xf32, #tpu.memory_space<vmem>>, vector<128x128xf32>
    tpu.vector_store %arg4[%c0_5, %c0_6], %5 {strides = array<i32>} : memref<128x128xf32, #tpu.memory_space<vmem>>, vector<128x128xf32>,
    return
  }
  func.func @transform_0(%arg0: i32) -> (i32, i32) {
    %c0_i32 = arith.constant 0 : i32
    %c0_i32_0 = arith.constant 0 : i32
    return %arg0, %c0_i32 : i32, i32
  }
  func.func @transform_1(%arg0: i32) -> (i32, i32) {
    %c0_i32 = arith.constant 0 : i32
    %c0_i32_0 = arith.constant 0 : i32
    %c0_i32_1 = arith.constant 0 : i32
    return %c0_i32, %c0_i32_0 : i32, i32
  }
  func.func @transform_2(%arg0: i32) -> (i32, i32) {
    %c0_i32 = arith.constant 0 : i32
    %c0_i32_0 = arith.constant 0 : i32
    %c0_i32_1 = arith.constant 0 : i32
    return %c0_i32, %c0_i32_0 : i32, i32
  }
  func.func @transform_3(%arg0: i32) -> (i32, i32) {
    %c0_i32 = arith.constant 0 : i32
    %c0_i32_0 = arith.constant 0 : i32
    return %arg0, %c0_i32 : i32, i32
  }
}

</mosaic_0001>

<bundles_post_ra>
// kernel: gcn_forward.5
= control target key start
LH: loop header
LB: loop body
LE: loop exit
PB: predicated region body
PF: predicated region fallthrough
CT: control target
= control target key end

     0   :  { %8 = vsyncpa [#allocation3], 0  ;;  %s1218_s0 = inlined_call_operand.hbm [shape: bf16[256,128], index: 0, kind: input, shape index: {}]   ;;  %s1219_s1 = inlined_call_operand.hbm [shape: bf16[128,128], index: 1, kind: input, shape index: {}]   ;;  %s1220_s2 = inlined_call_operand.hbm [shape: f32[1,128], index: 2, kind: input, shape index: {}]   ;;  %s1221_s3 = inlined_call_operand.hbm [shape: f32[256,128], index: 3, kind: output, shape index: {}]  }
   0x1   :  { %10 = vsyncpa [#allocation3 + $0x1], 0 }
   0x2   :  { %11 = vsyncpa [#allocation6], 0 }
   0x3   :  { %12 = vsyncpa [#allocation4], 0 }
   0x4   :  { %14 = vsyncpa [#allocation4 + $0x1], 0  ;;  %s947_s12 = smov 0   ;;  %s949_s13 = smov 0  }
   0x5   :  { %s951_s14 = smov 0   ;;  %s953_s15 = smov 0  }
   0x6 LB: > { %s968_s16 = sadd.s32 4294967295, %s917_s15   ;;  %s573_s17 = sadd.s32 4294967294, %s917_s15   ;;  %s917_s15 = sphi %s953_s15, %s1241_s15   ;;  %s913_s14 = sphi %s951_s14, %s1240_s14   ;;  %s909_s13 = sphi %s949_s13, %s1239_s13   ;;  %s905_s12 = sphi %s947_s12, %s1238_s12  }
   0x7   : > { %p40_p0 = scmp.ne.s32.totalorder %s909_s13, %s905_s12  ;;  %p1222_p1 = scmp.eq.s32.totalorder %s968_s16, 0 }
   0x8   : > { %p112_p3 = scmp.eq.s32.totalorder %s573_s17, 1  ;;  %p574_p5 = scmp.ge.s32.totalorder %s917_s15, 1 }
   0x9   : > { %p977_p4 = por %p1222_p1, %p40_p0  ;;  %p119_p7 = scmp.lt.s32.totalorder %s917_s15, 3 }
   0xa   : > { %p982_p6 = por %p112_p3, %p40_p0  ;;  %s919_s21 = smov [#allocation5]  }
   0xb   : > { %s1225_s18 = scalar_select %p977_p4, 1, 0 }
   0xc   : > { %s1226_s19 = scalar_select %p982_p6, 1, 0 }
   0xd   : > { %p987_p8 = pnand %p574_p5, %p119_p7  ;;  %s131_s22 = sshll.u32 %s919_s21, 4  ;;  %s991_s22 = int_to_ptr.vmem [resolvable:$true] %s131_s22 }
   0xe   : > { %s920_s24 = smov [#allocation7]   ;;  %s761_s28 = scalar_lea.hbm %s1219_s1, 1024 }
   0xf   : > { %p686_p9 = pneg %p987_p8  ;;  %s145_s25 = sshll.u32 %s920_s24, 4  ;;  %s1002_s25 = int_to_ptr.vmem [resolvable:$true] %s145_s25 }
  0x10   : > { %p762_p12 = scmp.ne.s32.totalorder %s1219_s1, %s761_s28  ;;  %p768_p5 = scmp.lt.u32.totalorder %s761_s28, %s1219_s1 }
  0x11   : > { %p998_p11 = pnand %p686_p9, %p1222_p1 }
  0x13   : > { %p763_p13 = pneg %p998_p11 }
  0x15   : > { %p764_p0 = pnand %p763_p13, %p762_p12 }
  0x17   : > { %p765_p3 = pneg %p764_p0 }
  0x19   : > { %p770_p7 = pnand %p768_p5, %p765_p3 }
  0x1b   : > { %773 = shalt.err (!%p770_p7)
}
  0x1c   : > { %s774_s6 = scalar_lea.vmem %s991_s22, 1024  ;;  %p782_p2 = scmp.lt.s32.totalorder %s991_s22, %s991_s22 }
  0x1d   : > { %p775_p9 = scmp.ne.s32.totalorder %s991_s22, %s774_s6  ;;  %p783_p12 = scmp.lt.s32.totalorder %s774_s6, %s774_s6 }
  0x1f   : > { %p777_p10 = pnand %p775_p9, %p763_p13  ;;  %p784_p0 = por %p783_p12, %p782_p2 }
  0x21   : > { %p778_p1 = pneg %p777_p10 }
  0x23   : > { %p785_p6 = pnand %p784_p0, %p778_p1 }
  0x25   : > { %788 = shalt.err (!%p785_p6)
}
  0x26   : > { %s921_s7 = smov 64   ;;  %s922_s8 = smov 4  }
  0x27   : > { %689 = dma.hbm_to_vmem [thread:$0]  (!%p998_p11), %s1219_s1, 1024, %s991_s22, [#allocation6], %s921_s7, %s921_s7, %s922_s8  }
  0x28   : > { %s789_s21 = scalar_lea.hbm %s1220_s2, 16 }
  0x29   : > { %p790_p1 = scmp.ne.s32.totalorder %s1220_s2, %s789_s21  ;;  %p796_p10 = scmp.lt.u32.totalorder %s789_s21, %s1220_s2 }
  0x2b   : > { %p792_p2 = pnand %p790_p1, %p763_p13 }
  0x2d   : > { %p793_p6 = pneg %p792_p2 }
  0x2f   : > { %p798_p3 = pnand %p796_p10, %p793_p6 }
  0x31   : > { %801 = shalt.err (!%p798_p3)
}
  0x32   : > { %s802_s22 = scalar_lea.vmem %s1002_s25, 16  ;;  %s809_s29 = scalar_lea.vmem %s1002_s25, 32 }
  0x33   : > { %p803_p5 = scmp.ne.s32.totalorder %s1002_s25, %s802_s22  ;;  %p810_p12 = scmp.lt.s32.totalorder %s1002_s25, %s1002_s25 }
  0x34   : > { %p811_p0 = scmp.lt.s32.totalorder %s809_s29, %s802_s22 }
  0x35   : > { %p805_p7 = pnand %p803_p5, %p763_p13 }
  0x36   : > { %p812_p1 = por %p811_p0, %p810_p12 }
  0x37   : > { %p806_p9 = pneg %p805_p7 }
  0x39   : > { %p813_p2 = pnand %p812_p1, %p806_p9 }
  0x3b   : > { %816 = shalt.err (!%p813_p2)
}
  0x3c   : > { %692 = dma.hbm_to_vmem [thread:$0]  (!%p998_p11), %s1220_s2, 16, %s1002_s25, [#allocation6]  }
  0x3d   : > { %s1061_s5 = sadd.s32 1, %s917_s15   ;;  %s27_s23 = sadd.s32 1, %s913_s14 }
  0x3e   : > { %s24_s6 = ssub.s32 %s917_s15, %s1061_s5  ;;  %p34_p13 = scmp.ne.s32.totalorder %s913_s14, %s909_s13 }
  0x3f   : > { %p25_p6 = scmp.eq.s32.totalorder %s24_s6, 0  ;;  %p35_p10 = scmp.eq.s32.totalorder %s917_s15, 0 }
  0x40   : > { %p1229_p3 = scmp.eq.s32.totalorder %s968_s16, 1  ;;  %p703_p7 = scmp.lt.s32.totalorder %s917_s15, 2 }
  0x41   : > { %s1077_s10 = scalar_select %p25_p6, %s913_s14, %s27_s23  }
  0x42   : > { %p1071_p5 = por %p1229_p3, %p34_p13  ;;  %p36_p9 = por %p35_p10, %p34_p13 }
  0x43   : > { %s156_s11 = sand.u32 1, %s913_s14   ;;  %s608_s25 = sshll.u32 %s917_s15, 10 }
  0x44   : > { %s1230_s9 = scalar_select %p1071_p5, 1, 0 }
  0x45   : > { %s578_s17 = sshll.u32 %s156_s11, 6  ;;  %s1084_s26 = scalar_lea.hbm %s1218_s0, %s608_s25 }
  0x46   : > { %s160_s27 = scalar_lea.vmem [#allocation2], %s578_s17  ;;  %p1088_p11 = pnand %p703_p7, %p36_p9 }
  0x47   : > { %s167_s28 = sshll.u32 %s160_s27, 4  ;;  %s1092_s29 = scalar_lea.sflag [#allocation3], %s156_s11  ;;  %s1086_s28 = int_to_ptr.vmem [resolvable:$true] %s167_s28 }
  0x48   : > { %s817_s30 = scalar_lea.hbm %s1084_s26, 1024  ;;  %p819_p0 = pneg %p1088_p11 }
  0x49   : > { %p818_p12 = scmp.ne.s32.totalorder %s1084_s26, %s817_s30  ;;  %s822_s6 = scalar_lea.hbm %s1218_s0, 2048 }
  0x4a   : > { %p823_p13 = scmp.lt.u32.totalorder %s1084_s26, %s1218_s0  ;;  %p824_p6 = scmp.lt.u32.totalorder %s822_s6, %s817_s30 }
  0x4b   : > { %p820_p1 = pnand %p819_p0, %p818_p12  ;;  %p826_p3 = scmp.lt.u32.totalorder %s817_s30, %s1084_s26 }
  0x4c   : > { %p825_p10 = por %p824_p6, %p823_p13 }
  0x4d   : > { %p821_p2 = pneg %p820_p1 }
  0x4e   : > { %p827_p7 = por %p826_p3, %p825_p10 }
  0x50   : > { %p828_p9 = pnand %p827_p7, %p821_p2 }
  0x52   : > { %831 = shalt.err (!%p828_p9)
}
  0x53   : > { %s832_s11 = scalar_lea.vmem %s1086_s28, 1024  ;;  %s923_s21 = smov [#allocation2]  }
  0x54   : > { %p833_p12 = scmp.ne.s32.totalorder %s1086_s28, %s832_s11  ;;  %s837_s24 = sshll.u32 %s923_s21, 4  ;;  %s838_s24 = int_to_ptr.vmem [resolvable:$false] %s837_s24 }
  0x55   : > { %s839_s27 = scalar_lea.vmem %s838_s24, 2048  ;;  %p840_p4 = scmp.lt.s32.totalorder %s1086_s28, %s838_s24 }
  0x56   : > { %p835_p1 = pnand %p833_p12, %p819_p0  ;;  %p841_p13 = scmp.lt.s32.totalorder %s839_s27, %s832_s11 }
  0x58   : > { %p836_p5 = pneg %p835_p1  ;;  %p842_p6 = por %p841_p13, %p840_p4 }
  0x5a   : > { %p843_p10 = pnand %p842_p6, %p836_p5 }
  0x5c   : > { %846 = shalt.err (!%p843_p10)
}
  0x5d   : > { %696 = dma.hbm_to_vmem [thread:$0]  (!%p1088_p11), %s1084_s26, 1024, %s1086_s28, %s1092_s29, %s921_s7, %s921_s7, %s922_s8  }
  0x5e   : > { %179 = sbr.rel (%p987_p8) target bundleno = 378 (0x17a), region = 32  ;;  %s1126_s30 = sand.u32 (!%p987_p8), 1, %s909_s13  }
  0x5f   : > { %s582_s4 = sshll.u32 (!%p987_p8), %s1126_s30, 6  ;;  %s182_s23 = scalar_lea.sflag (!%p987_p8), [#allocation3], %s1126_s30 }
  0x60   : > { %s1130_s6 = scalar_lea.vmem (!%p987_p8), [#allocation2], %s582_s4  ;;  %p1232_p4 = scmp.ne.s32.totalorder (!%p987_p8), %s1225_s18, 0 }
  0x65   : > { %892 = dma.done.wait (%p1232_p4), %s182_s23, 1024  }
  0x66   : > { %894 = vsyncadd (%p1232_p4), %s182_s23, 4294966272  ;;  %p1233_p5 = scmp.eq.s32.totalorder %s968_s16, 0 }
  0x68   : > { %896 = dma.done.wait (%p1233_p5), [#allocation6], 1040   ;;  %p1234_p8 = pmov %p1233_p5 }
  0x69   : > { %v745_v0 = vld [vmem:[#allocation5] sm:$0xff]   ;;  %v746_v1 = vld [vmem:[#allocation5 + $0x8] sm:$0xff]   ;;  %v747_v2 = vld [vmem:[#allocation5 + $0x10] sm:$0xff]   ;;  %s585_s18 = sshll.u32 %s1126_s30, 7  ;;  %s609_s7 = sshll.u32 %s968_s16, 11 }
  0x6a   : > { %898 = vsyncadd (%p1234_p8), [#allocation6], 4294966256  ;;  %626 = vmatprep.subr.bf16.mxu0 %v745_v0  ;;  %658 = vmatprep.subr.bf16.mxu1 %v745_v0  ;;  %v748_v3 = vld [vmem:[#allocation5 + $0x18] sm:$0xff]   ;;  %v753_v4 = vld [vmem:[%s1130_s6] sm:$0xff]   ;;  %s1149_s20 = scalar_lea.vmem [#allocation8], %s585_s18  ;;  %s1166_s28 = scalar_lea.hbm %s1221_s3, %s609_s7 }
  0x6b   : > { %627 = vmatpush3.bf16.msra.mxu0 %v745_v0  ;;  %666 = vmatpush3.bf16.msra.mxu1 %v745_v0  ;;  %v754_v5 = vld [vmem:[%s1130_s6 + $0x20] sm:$0xff]   ;;  %v750_v7 = vld [vmem:[#allocation5 + $0x28] sm:$0xff]   ;;  %v751_v8 = vld [vmem:[#allocation5 + $0x30] sm:$0xff]   ;;  %s481_s8 = sshll.u32 %s1149_s20, 4  ;;  %s468_s22 = scalar_lea.sflag [#allocation4], %s1126_s30  ;;  %s1168_s8 = int_to_ptr.vmem [resolvable:$true] %s481_s8 }
  0x6c   : > { %628 = vmatprep.subr.bf16.mxu0 %v746_v1  ;;  %659 = vmatprep.subr.bf16.mxu1 %v746_v1  ;;  %v749_v6 = vld [vmem:[#allocation5 + $0x20] sm:$0xff]   ;;  %v752_v9 = vld [vmem:[#allocation5 + $0x38] sm:$0xff]   ;;  %v755_v10 = vld [vmem:[%s1130_s6 + $0x8] sm:$0xff]   ;;  %s847_s29 = scalar_lea.vmem %s1168_s8, 2048  ;;  %p1235_p0 = scmp.ne.s32.totalorder %s1230_s9, 0 }
  0x6d   : > { %642 = vmatprep.mubr.bf16.mxu0 %v753_v4  ;;  %650 = vmatprep.mubr.bf16.mxu1 %v754_v5  ;;  %v756_v11 = vld [vmem:[%s1130_s6 + $0x28] sm:$0xff]   ;;  %v757_v12 = vld [vmem:[%s1130_s6 + $0x10] sm:$0xff]   ;;  %v759_v14 = vld [vmem:[%s1130_s6 + $0x18] sm:$0xff]   ;;  %p848_p11 = scmp.ne.s32.totalorder %s1168_s8, %s847_s29  ;;  %s924_s17 = smov [#allocation8]  }
  0x6e   : > { %v758_v13 = vld [vmem:[%s1130_s6 + $0x30] sm:$0xff]   ;;  %v760_v15 = vld [vmem:[%s1130_s6 + $0x38] sm:$0xff]   ;;  %v586_v16 = vld [vmem:[#allocation7] ss:$0 sm:$0xff]  ;;  %s851_s25 = sshll.u32 %s924_s17, 4  ;;  %s852_s25 = int_to_ptr.vmem [resolvable:$false] %s851_s25 }
  0x6f   : > { %629 = vmatpush3.bf16.msra.mxu0 %v746_v1  ;;  %667 = vmatpush3.bf16.msra.mxu1 %v746_v1  ;;  %p849_p2 = pnand %p848_p11, %p1235_p0  ;;  %s853_s11 = scalar_lea.vmem %s852_s25, 4096 }
  0x70   : > { %630 = vmatprep.subr.bf16.mxu0 %v747_v2  ;;  %660 = vmatprep.subr.bf16.mxu1 %v747_v2  ;;  %p854_p7 = scmp.lt.s32.totalorder %s1168_s8, %s852_s25  ;;  %p855_p9 = scmp.lt.s32.totalorder %s853_s11, %s847_s29 }
  0x71   : > { %p850_p3 = pneg %p849_p2 }
  0x72   : > { %p856_p12 = por %p855_p9, %p854_p7 }
  0x73   : > { %631 = vmatpush3.bf16.msra.mxu0 %v747_v2  ;;  %668 = vmatpush3.bf16.msra.mxu1 %v747_v2 }
  0x74   : > { %632 = vmatprep.subr.bf16.mxu0 %v748_v3  ;;  %661 = vmatprep.subr.bf16.mxu1 %v748_v3  ;;  %p857_p1 = pnand %p856_p12, %p850_p3 }
  0x77   : > { %633 = vmatpush3.bf16.msra.mxu0 %v748_v3  ;;  %669 = vmatpush3.bf16.msra.mxu1 %v748_v3 }
  0x78   : > { %634 = vmatprep.subr.bf16.mxu0 %v749_v6  ;;  %662 = vmatprep.subr.bf16.mxu1 %v749_v6 }
  0x7b   : > { %635 = vmatpush3.bf16.msra.mxu0 %v749_v6  ;;  %670 = vmatpush3.bf16.msra.mxu1 %v749_v6 }
  0x7c   : > { %636 = vmatprep.subr.bf16.mxu0 %v750_v7  ;;  %663 = vmatprep.subr.bf16.mxu1 %v750_v7 }
  0x7f   : > { %637 = vmatpush3.bf16.msra.mxu0 %v750_v7  ;;  %671 = vmatpush3.bf16.msra.mxu1 %v750_v7 }
  0x80   : > { %638 = vmatprep.subr.bf16.mxu0 %v751_v8  ;;  %664 = vmatprep.subr.bf16.mxu1 %v751_v8 }
  0x83   : > { %639 = vmatpush3.bf16.msra.mxu0 %v751_v8  ;;  %672 = vmatpush3.bf16.msra.mxu1 %v751_v8 }
  0x84   : > { %640 = vmatprep.subr.bf16.mxu0 %v752_v9  ;;  %665 = vmatprep.subr.bf16.mxu1 %v752_v9 }
  0x87   : > { %641 = vmatpush3.bf16.msra.mxu0 %v752_v9  ;;  %673 = vmatpush3.bf16.msra.mxu1 %v752_v9 }
  0x8a   : > { %643 = vmatmul.mubr.bf16.vlgmr.msra.gmra.mrb[0].mxu0 %v755_v10  ;;  %651 = vmatmul.mubr.bf16.vlgmr.msra.gmra.mrb[0].mxu1 %v756_v11 }
  0x8b   : > { %646 = vmatprep.mubr.bf16.mxu0 %v757_v12  ;;  %654 = vmatprep.mubr.bf16.mxu1 %v758_v13 }
  0x92   : > { %647 = vmatmul.mubr.bf16.gmra.mrb[4].mxu0 %v759_v14  ;;  %655 = vmatmul.mubr.bf16.gmra.mrb[4].mxu1 %v760_v15 }
 0x15d   : > { %v644_v17 = vpop.f32.mrb[0].mxu0  ;;  %v652_v18 = vpop.f32.mrb[0].mxu1 }
 0x15e   : > { %v397_v19 = vadd.f32 %v644_v17, %v586_v16  ;;  %v429_v20 = vadd.f32 %v652_v18, %v586_v16  ;;  %v388_v21 = vpop.f32.mrb[1].mxu0  ;;  %v420_v22 = vpop.f32.mrb[1].mxu1 }
 0x15f   : > { %v389_v23 = vadd.f32 %v586_v16, %v388_v21  ;;  %v421_v24 = vadd.f32 %v586_v16, %v420_v22  ;;  %v645_v25 = vpop.f32.mrb[2].mxu0  ;;  %v653_v26 = vpop.f32.mrb[2].mxu1 }
 0x160   : > { %453 = vst [vmem:[%s1149_s20 + $0x10] sm:$0xff] %v397_v19  ;;  %461 = vst [vmem:[%s1149_s20 + $0x50] sm:$0xff] %v429_v20  ;;  %v400_v27 = vadd.f32 %v645_v25, %v586_v16  ;;  %v432_v28 = vadd.f32 %v653_v26, %v586_v16  ;;  %v391_v29 = vpop.f32.mrb[3].mxu0  ;;  %v423_v30 = vpop.f32.mrb[3].mxu1 }
 0x161   : > { %451 = vst [vmem:[%s1149_s20] sm:$0xff] %v389_v23  ;;  %459 = vst [vmem:[%s1149_s20 + $0x40] sm:$0xff] %v421_v24  ;;  %v392_v31 = vadd.f32 %v586_v16, %v391_v29  ;;  %v424_v32 = vadd.f32 %v586_v16, %v423_v30 }
 0x162   : > { %454 = vst [vmem:[%s1149_s20 + $0x18] sm:$0xff] %v400_v27  ;;  %462 = vst [vmem:[%s1149_s20 + $0x58] sm:$0xff] %v432_v28 }
 0x163   : > { %452 = vst [vmem:[%s1149_s20 + $0x8] sm:$0xff] %v392_v31  ;;  %460 = vst [vmem:[%s1149_s20 + $0x48] sm:$0xff] %v424_v32 }
 0x165   : > { %v648_v33 = vpop.f32.mrb[4].mxu0  ;;  %v656_v34 = vpop.f32.mrb[4].mxu1 }
 0x166   : > { %v413_v35 = vadd.f32 %v648_v33, %v586_v16  ;;  %v445_v36 = vadd.f32 %v656_v34, %v586_v16  ;;  %v404_v37 = vpop.f32.mrb[5].mxu0  ;;  %v436_v38 = vpop.f32.mrb[5].mxu1 }
 0x167   : > { %v405_v39 = vadd.f32 %v586_v16, %v404_v37  ;;  %v437_v40 = vadd.f32 %v586_v16, %v436_v38  ;;  %v649_v41 = vpop.f32.mrb[6].mxu0  ;;  %v657_v42 = vpop.f32.mrb[6].mxu1 }
 0x168   : > { %457 = vst [vmem:[%s1149_s20 + $0x30] sm:$0xff] %v413_v35  ;;  %465 = vst [vmem:[%s1149_s20 + $0x70] sm:$0xff] %v445_v36  ;;  %v416_v43 = vadd.f32 %v649_v41, %v586_v16  ;;  %v448_v44 = vadd.f32 %v657_v42, %v586_v16  ;;  %v407_v45 = vpop.f32.mrb[7].mxu0  ;;  %v439_v46 = vpop.f32.mrb[7].mxu1 }
 0x169   : > { %455 = vst [vmem:[%s1149_s20 + $0x20] sm:$0xff] %v405_v39  ;;  %463 = vst [vmem:[%s1149_s20 + $0x60] sm:$0xff] %v437_v40  ;;  %v408_v47 = vadd.f32 %v586_v16, %v407_v45  ;;  %v440_v48 = vadd.f32 %v586_v16, %v439_v46 }
 0x16a   : > { %458 = vst [vmem:[%s1149_s20 + $0x38] sm:$0xff] %v416_v43  ;;  %466 = vst [vmem:[%s1149_s20 + $0x78] sm:$0xff] %v448_v44 }
 0x16b   : > { %456 = vst [vmem:[%s1149_s20 + $0x28] sm:$0xff] %v408_v47  ;;  %464 = vst [vmem:[%s1149_s20 + $0x68] sm:$0xff] %v440_v48 }
 0x16c   : > { %860 = shalt.err (!%p857_p1)
}
 0x16d   : > { %s861_s21 = scalar_lea.hbm %s1166_s28, 2048  ;;  %s865_s4 = scalar_lea.hbm %s1221_s3, 4096 }
 0x16e   : > { %p862_p13 = scmp.ne.s32.totalorder %s1166_s28, %s861_s21  ;;  %p866_p4 = scmp.lt.u32.totalorder %s1166_s28, %s1221_s3 }
 0x16f   : > { %p867_p5 = scmp.lt.u32.totalorder %s865_s4, %s861_s21  ;;  %p869_p11 = scmp.lt.u32.totalorder %s861_s21, %s1166_s28 }
 0x170   : > { %p863_p6 = pnand %p862_p13, %p1235_p0 }
 0x171   : > { %p868_p8 = por %p867_p5, %p866_p4 }
 0x172   : > { %p864_p10 = pneg %p863_p6 }
 0x173   : > { %p870_p2 = por %p869_p11, %p868_p8 }
 0x175   : > { %p871_p3 = pnand %p870_p2, %p864_p10 }
 0x177   : > { %874 = shalt.err (!%p871_p3)
}
 0x178   : > { %s925_s18 = smov 128   ;;  %s926_s20 = smov 8  }
 0x179   : > { %684 = dma.vmem_to_hbm [thread:$0]  (%p1235_p0), %s1168_s8, 2048, %s1166_s28, %s468_s22, %s925_s18, %s925_s18, %s926_s20  }
 0x17a PF: > { %s496_s7 = sand.u32 1, %s905_s12   ;;  %p1236_p7 = scmp.ne.s32.totalorder %s1226_s19, 0 }
 0x17b   : > { %p1237_p9 = scmp.ge.s32.totalorder %s917_s15, 2  ;;  %s497_s16 = scalar_lea.sflag [#allocation4], %s496_s7 }
 0x17d   : > { %p698_p12 = pnand %p1237_p9, %p1236_p7 }
 0x17f   : > { %900 = dma.done.wait (!%p698_p12), %s497_s16, 2048  }
 0x180   : > { %902 = vsyncadd (!%p698_p12), %s497_s16, 4294965248  ;;  %p17_p1 = scmp.ge.s32.totalorder %s1061_s5, 4   ;;  %s1238_s12 = smov %s909_s13 }
 0x181   : > { %s1239_s13 = smov %s913_s14  ;;  %s1240_s14 = smov %s1077_s10 }
 0x182   : > { %s1241_s15 = smov %s1061_s5  ;;  %19 = sbr.rel (!%p17_p1) target bundleno = 6 (0x6), region = 85 }
 0x189   :  { %502 = vsyncpa [#allocation3], 1 }
 0x18a   :  { %504 = vsyncpa [#allocation3 + $0x1], 1 }
 0x18b   :  { %505 = vsyncpa [#allocation6], 1 }
 0x18c   :  { %506 = vsyncpa [#allocation4], 1 }
 0x18d   :  { %508 = vsyncpa [#allocation4 + $0x1], 1 }

// kernel: gcn_forward.3
= control target key start
LH: loop header
LB: loop body
LE: loop exit
PB: predicated region body
PF: predicated region fallthrough
CT: control target
= control target key end

     0   :  { %s2966_s0 = inlined_call_operand.hbm [shape: bf16[256,256], index: 0, kind: input, shape index: {}]   ;;  %s2967_s1 = inlined_call_operand.hbm [shape: bf16[256,128], index: 1, kind: input, shape index: {}]   ;;  %s2968_s2 = inlined_call_operand.hbm [shape: bf16[128,128], index: 2, kind: input, shape index: {}]   ;;  %s2969_s3 = inlined_call_operand.hbm [shape: f32[1,128], index: 3, kind: input, shape index: {}]   ;;  %s2970_s4 = inlined_call_operand.hbm [shape: f32[1,128], index: 4, kind: input, shape index: {}]   ;;  %s2971_s5 = inlined_call_operand.hbm [shape: f32[1,128], index: 5, kind: input, shape index: {}]   ;;  %s2972_s6 = inlined_call_operand.hbm [shape: bf16[256,128], index: 6, kind: output, shape index: {}]  }
   0x1   :  { %2996 = sst [smem:[#allocation30_spill]] %s2968_s2 }
   0x2   :  { %2997 = sst [smem:[#allocation31_spill]] %s2969_s3 }
   0x3   :  { %2998 = sst [smem:[#allocation32_spill]] %s2970_s4 }
   0x4   :  { %2999 = sst [smem:[#allocation33_spill]] %s2971_s5 }
   0x5   :  { %3000 = sst [smem:[#allocation34_spill]] %s2972_s6 }
   0x6   :  { %11 = vsyncpa [#allocation4], 0 }
   0x7   :  { %13 = vsyncpa [#allocation4 + $0x1], 0 }
   0x8   :  { %14 = vsyncpa [#allocation7], 0 }
   0x9   :  { %16 = vsyncpa [#allocation7 + $0x1], 0 }
   0xa   :  { %17 = vsyncpa [#allocation10], 0 }
   0xb   :  { %18 = vsyncpa [#allocation13], 0 }
   0xc   :  { %19 = vsyncpa [#allocation5], 0 }
   0xd   :  { %21 = vsyncpa [#allocation5 + $0x1], 0  ;;  %s2267_s21 = smov 0   ;;  %s2269_s22 = smov 0  }
   0xe   :  { %s2271_s23 = smov 0   ;;  %s2273_s24 = smov 0  }
   0xf   :  { %s2275_s25 = smov 0   ;;  %s2277_s26 = smov 0  }
  0x10   :  { %s2279_s27 = smov 0   ;;  %s2281_s28 = smov 0  }
  0x11   :  { %s2283_s29 = smov 0   ;;  %s2285_s30 = smov 0  }
  0x12   :  { %s2287_s7 = smov 0   ;;  %s2289_s8 = smov 0  }
  0x13   :  { %s2291_s9 = smov 0   ;;  %s2293_s10 = smov 0  }
  0x14 LB: > { %3001 = sst [smem:[#allocation21_spill]] %s2165_s21  ;;  %s2334_s11 = sadd.s32 4294967295, %s2217_s10   ;;  %s2217_s10 = sphi %s2293_s10, %s27_s10   ;;  %s2213_s9 = sphi %s2291_s9, %s3065_s9   ;;  %s2209_s8 = sphi %s2289_s8, %s3064_s8   ;;  %s2205_s7 = sphi %s2287_s7, %s3063_s7   ;;  %s2201_s30 = sphi %s2285_s30, %s3062_s30   ;;  %s2197_s29 = sphi %s2283_s29, %s3061_s29   ;;  %s2193_s28 = sphi %s2281_s28, %s3060_s28   ;;  %s2189_s27 = sphi %s2279_s27, %s3059_s27   ;;  %s2185_s26 = sphi %s2277_s26, %s3058_s26   ;;  %s2181_s25 = sphi %s2275_s25, %s3057_s25   ;;  %s2177_s24 = sphi %s2273_s24, %s3056_s24   ;;  %s2173_s23 = sphi %s2271_s23, %s3055_s23   ;;  %s2169_s22 = sphi %s2269_s22, %s3054_s22   ;;  %s2165_s21 = sphi %s2267_s21, %s3051_s21  }
  0x15   : > { %3002 = sst [smem:[#allocation22_spill]] %s2169_s22  ;;  %s1383_s12 = sadd.s32 4294967294, %s2217_s10  }
  0x16   : > { %3003 = sst [smem:[#allocation23_spill]] %s2201_s30  ;;  %p61_p0 = scmp.ne.s32.totalorder %s2193_s28, %s2189_s27 }
  0x17   : > { %3004 = sst [smem:[#allocation24_spill]] %s2205_s7  ;;  %p2978_p1 = scmp.eq.s32.totalorder %s2334_s11, 0 }
  0x18   : > { %3005 = sst [smem:[#allocation25_spill]] %s2334_s11  ;;  %p87_p2 = scmp.ne.s32.totalorder %s2181_s25, %s2177_s24 }
  0x19   : > { %p194_p3 = scmp.ne.s32.totalorder %s2173_s23, %s2169_s22  ;;  %p2344_p4 = por %p2978_p1, %p61_p0 }
  0x1a   : > { %p195_p5 = scmp.eq.s32.totalorder %s2334_s11, 3  ;;  %p2351_p6 = por %p87_p2, %p2978_p1 }
  0x1b   : > { %s3006_s13 = scalar_select %p2344_p4, 1, 0 }
  0x1c   : > { %s3007_s14 = scalar_select %p2351_p6, 1, 0 }
  0x1d   : > { %p200_p7 = scmp.ne.s32.totalorder %s2169_s22, %s2165_s21  ;;  %p2357_p8 = por %p195_p5, %p194_p3 }
  0x1e   : > { %3008 = sst [smem:[#allocation26_spill]] %s3007_s14  ;;  %p201_p9 = scmp.eq.s32.totalorder %s1383_s12, 3 }
  0x1f   : > { %s3009_s15 = scalar_select %p2357_p8, 1, 0 }
  0x20   : > { %p1384_p10 = scmp.ge.s32.totalorder %s2217_s10, 1  ;;  %p208_p11 = scmp.lt.s32.totalorder %s2217_s10, 5 }
  0x21   : > { %3010 = sst [smem:[#allocation27_spill]] %s3009_s15  ;;  %p2363_p12 = por %p201_p9, %p200_p7 }
  0x22   : > { %p2367_p13 = pnand %p1384_p10, %p208_p11  ;;  %s2219_s18 = smov [#allocation8]  }
  0x23   : > { %s3011_s16 = scalar_select %p2363_p12, 1, 0 }
  0x24   : > { %s3013_s17 = scalar_select %p2367_p13, 1, 0 }
  0x25   : > { %3012 = sst [smem:[#allocation28_spill]] %s3011_s16  ;;  %s220_s19 = sshll.u32 %s2219_s18, 4  ;;  %s221_s19 = int_to_ptr.vmem [resolvable:$true] %s220_s19 }
  0x26   : > { %p1671_p0 = pneg %p2367_p13  ;;  %s2220_s24 = smov [#allocation9]  }
  0x27   : > { %s234_s27 = sshll.u32 %s2220_s24, 4  ;;  %s3015_s2 = sld [smem:[#allocation30_spill]]  ;;  %s2379_s27 = int_to_ptr.vmem [resolvable:$true] %s234_s27 }
  0x28   : > { %p2375_p2 = pnand %p1671_p0, %p2978_p1 }
  0x2a   : > { %p2389_p5 = pneg %p2375_p2 }
  0x2d   : > { %s1883_s21 = scalar_lea.hbm %s3015_s2, 1024 }
  0x2e   : > { %p1884_p3 = scmp.ne.s32.totalorder %s3015_s2, %s1883_s21  ;;  %p1890_p10 = scmp.lt.u32.totalorder %s1883_s21, %s3015_s2 }
  0x30   : > { %p1886_p7 = pnand %p2389_p5, %p1884_p3 }
  0x32   : > { %p1887_p9 = pneg %p1886_p7 }
  0x34   : > { %p1892_p11 = pnand %p1890_p10, %p1887_p9 }
  0x36   : > { %1895 = shalt.err (!%p1892_p11)
}
  0x37   : > { %s1896_s16 = scalar_lea.vmem %s221_s19, 1024  ;;  %p1904_p8 = scmp.lt.s32.totalorder %s221_s19, %s221_s19 }
  0x38   : > { %p1897_p0 = scmp.ne.s32.totalorder %s221_s19, %s1896_s16  ;;  %p1905_p6 = scmp.lt.s32.totalorder %s1896_s16, %s1896_s16 }
  0x3a   : > { %p1899_p1 = pnand %p1897_p0, %p2389_p5  ;;  %p1906_p4 = por %p1905_p6, %p1904_p8 }
  0x3c   : > { %p1900_p12 = pneg %p1899_p1 }
  0x3e   : > { %p1907_p13 = pnand %p1906_p4, %p1900_p12 }
  0x40   : > { %1910 = shalt.err (!%p1907_p13)
}
  0x41   : > { %s2989_s6 = smov 64   ;;  %s2991_s15 = smov 4  }
  0x42   : > { %1674 = dma.hbm_to_vmem [thread:$0]  (!%p2375_p2), %s3015_s2, 1024, %s221_s19, [#allocation7], %s2989_s6, %s2989_s6, %s2991_s15  }
  0x43   : > { %s3017_s3 = sld [smem:[#allocation31_spill]] }
  0x49   : > { %s1911_s30 = scalar_lea.hbm %s3017_s3, 16 }
  0x4a   : > { %p1912_p1 = scmp.ne.s32.totalorder %s3017_s3, %s1911_s30  ;;  %p1918_p8 = scmp.lt.u32.totalorder %s1911_s30, %s3017_s3 }
  0x4c   : > { %p1914_p4 = pnand %p1912_p1, %p2389_p5 }
  0x4e   : > { %p1915_p6 = pneg %p1914_p4 }
  0x50   : > { %p1920_p12 = pnand %p1918_p8, %p1915_p6 }
  0x52   : > { %1923 = shalt.err (!%p1920_p12)
}
  0x53   : > { %s1924_s19 = scalar_lea.vmem %s2379_s27, 16  ;;  %s1931_s22 = scalar_lea.vmem %s2379_s27, 32 }
  0x54   : > { %p1925_p13 = scmp.ne.s32.totalorder %s2379_s27, %s1924_s19  ;;  %p1932_p9 = scmp.lt.s32.totalorder %s2379_s27, %s2379_s27 }
  0x55   : > { %p1933_p10 = scmp.lt.s32.totalorder %s1931_s22, %s1924_s19 }
  0x56   : > { %p1927_p3 = pnand %p1925_p13, %p2389_p5 }
  0x57   : > { %p1934_p11 = por %p1933_p10, %p1932_p9 }
  0x58   : > { %p1928_p7 = pneg %p1927_p3 }
  0x5a   : > { %p1935_p0 = pnand %p1934_p11, %p1928_p7 }
  0x5c   : > { %1938 = shalt.err (!%p1935_p0)
}
  0x5d   : > { %1677 = dma.hbm_to_vmem [thread:$0]  (!%p2375_p2), %s3017_s3, 16, %s2379_s27, [#allocation10]  }
  0x5e   : > { %s2223_s14 = smov [#allocation11]   ;;  %s2224_s7 = smov [#allocation12]  }
  0x5f   : > { %s245_s21 = sshll.u32 %s2223_s14, 4  ;;  %s256_s12 = sshll.u32 %s2224_s7, 4  ;;  %s246_s21 = int_to_ptr.vmem [resolvable:$true] %s245_s21  ;;  %s257_s12 = int_to_ptr.vmem [resolvable:$true] %s256_s12 }
  0x60   : > { %s3018_s4 = sld [smem:[#allocation32_spill]] }
  0x66   : > { %s1939_s19 = scalar_lea.hbm %s3018_s4, 16 }
  0x67   : > { %p1940_p1 = scmp.ne.s32.totalorder %s3018_s4, %s1939_s19  ;;  %p1946_p8 = scmp.lt.u32.totalorder %s1939_s19, %s3018_s4 }
  0x69   : > { %p1942_p4 = pnand %p1940_p1, %p2389_p5 }
  0x6b   : > { %p1943_p6 = pneg %p1942_p4 }
  0x6d   : > { %p1948_p12 = pnand %p1946_p8, %p1943_p6 }
  0x6f   : > { %1951 = shalt.err (!%p1948_p12)
}
  0x70   : > { %s1952_s27 = scalar_lea.vmem %s246_s21, 16  ;;  %s1959_s11 = scalar_lea.vmem %s246_s21, 32 }
  0x71   : > { %p1953_p13 = scmp.ne.s32.totalorder %s246_s21, %s1952_s27  ;;  %p1960_p9 = scmp.lt.s32.totalorder %s246_s21, %s246_s21 }
  0x72   : > { %p1961_p10 = scmp.lt.s32.totalorder %s1959_s11, %s1952_s27 }
  0x73   : > { %p1955_p3 = pnand %p1953_p13, %p2389_p5 }
  0x74   : > { %p1962_p11 = por %p1961_p10, %p1960_p9 }
  0x75   : > { %p1956_p7 = pneg %p1955_p3 }
  0x77   : > { %p1963_p0 = pnand %p1962_p11, %p1956_p7 }
  0x79   : > { %1966 = shalt.err (!%p1963_p0)
}
  0x7a   : > { %1680 = dma.hbm_to_vmem [thread:$0]  (!%p2375_p2), %s3018_s4, 16, %s246_s21, [#allocation10]  }
  0x7b   : > { %s3019_s5 = sld [smem:[#allocation33_spill]] }
  0x81   : > { %s1967_s24 = scalar_lea.hbm %s3019_s5, 16 }
  0x82   : > { %p1968_p1 = scmp.ne.s32.totalorder %s3019_s5, %s1967_s24  ;;  %p1974_p8 = scmp.lt.u32.totalorder %s1967_s24, %s3019_s5 }
  0x84   : > { %p1970_p4 = pnand %p1968_p1, %p2389_p5 }
  0x86   : > { %p1971_p6 = pneg %p1970_p4 }
  0x88   : > { %p1976_p12 = pnand %p1974_p8, %p1971_p6 }
  0x8a   : > { %1979 = shalt.err (!%p1976_p12)
}
  0x8b   : > { %s1980_s27 = scalar_lea.vmem %s257_s12, 16  ;;  %s1987_s21 = scalar_lea.vmem %s257_s12, 32 }
  0x8c   : > { %p1981_p13 = scmp.ne.s32.totalorder %s257_s12, %s1980_s27  ;;  %p1988_p9 = scmp.lt.s32.totalorder %s257_s12, %s257_s12 }
  0x8d   : > { %p1989_p10 = scmp.lt.s32.totalorder %s1987_s21, %s1980_s27 }
  0x8e   : > { %p1983_p3 = pnand %p1981_p13, %p2389_p5 }
  0x8f   : > { %p1990_p11 = por %p1989_p10, %p1988_p9 }
  0x90   : > { %p1984_p7 = pneg %p1983_p3 }
  0x92   : > { %p1991_p0 = pnand %p1990_p11, %p1984_p7 }
  0x94   : > { %1994 = shalt.err (!%p1991_p0)
}
  0x95   : > { %1683 = dma.hbm_to_vmem [thread:$0]  (!%p2375_p2), %s3019_s5, 16, %s257_s12, [#allocation13]  }
  0x96   : > { %s36_s18 = sadd.s32 1, %s2209_s8  ;;  %s39_s20 = sadd.s32 1, %s2213_s9 }
  0x97   : > { %p37_p5 = scmp.ge.s32.totalorder %s36_s18, 2  ;;  %s48_s14 = sadd.s32 1, %s2197_s29 }
  0x98   : > { %p55_p1 = scmp.ne.s32.totalorder %s2197_s29, %s2193_s28  ;;  %p2995_p4 = scmp.eq.s32.totalorder %s2217_s10, 0 }
  0x99   : > { %s3067_s18 = smov (%p37_p5, %s36_s18), 0  ;;  %s3069_s20 = smov (!%p37_p5, %s39_s20), %s2213_s9 }
  0x9a   : > { %3020 = sst [smem:[#allocation29_spill]] %s3067_s18  ;;  %s2478_s15 = ssub.s32 %s2209_s8, %s3067_s18 }
  0x9b   : > { %p41_p2 = scmp.ge.s32.totalorder %s3069_s20, 2  ;;  %p72_p6 = scmp.eq.s32.totalorder %s2478_s15, 0 }
  0x9c   : > { %p2484_p8 = por %p2995_p4, %p55_p1  ;;  %s184_s7 = sadd.s32 1, %s2173_s23 }
  0x9d   : > { %s3071_s20 = smov (%p41_p2, %s3069_s20), 0  ;;  %p2994_p12 = scmp.lt.s32.totalorder %s2217_s10, 4 }
  0x9e   : > { %s267_s24 = sand.u32 1, %s2197_s29   ;;  %s43_s16 = ssub.s32 %s2213_s9, %s3071_s20 }
  0x9f   : > { %s45_s19 = sor.u32 %s2478_s15, %s43_s16  ;;  %p182_p13 = scmp.eq.s32.totalorder %s43_s16, 0 }
  0xa0   : > { %p46_p3 = scmp.eq.s32.totalorder %s45_s19, 0  ;;  %s1390_s22 = sshll.u32 %s267_s24, 6 }
  0xa1   : > { %s2497_s30 = scalar_select %p182_p13, %s2173_s23, %s184_s7  }
  0xa2   : > { %s2500_s27 = scalar_select %p46_p3, %s2197_s29, %s48_s14  }
  0xa3   : > { %s1455_s21 = sshll.u32 %s2213_s9, 5  ;;  %s271_s6 = scalar_lea.vmem [#allocation3], %s1390_s22 }
  0xa4   : > { %s277_s11 = sadd.s32 %s2209_s8, %s1455_s21  ;;  %s280_s2 = sshll.u32 %s271_s6, 4  ;;  %s2504_s2 = int_to_ptr.vmem [resolvable:$true] %s280_s2 }
  0xa5   : > { %s1393_s3 = sshll.u32 %s277_s11, 6  ;;  %p2515_p7 = pnand %p2994_p12, %p2484_p8 }
  0xa6   : > { %s2509_s18 = scalar_lea.hbm %s2966_s0, %s1393_s3  ;;  %s2519_s7 = scalar_lea.sflag [#allocation4], %s267_s24 }
  0xa7   : > { %s1995_s16 = scalar_lea.hbm %s2509_s18, 1024  ;;  %p1997_p10 = pneg %p2515_p7 }
  0xa8   : > { %p1996_p9 = scmp.ne.s32.totalorder %s2509_s18, %s1995_s16  ;;  %s2000_s5 = scalar_lea.hbm %s2966_s0, 4096 }
  0xa9   : > { %p2001_p5 = scmp.lt.u32.totalorder %s2509_s18, %s2966_s0  ;;  %p2002_p1 = scmp.lt.u32.totalorder %s2000_s5, %s1995_s16 }
  0xaa   : > { %p1998_p11 = pnand %p1997_p10, %p1996_p9  ;;  %p2004_p8 = scmp.lt.u32.totalorder %s1995_s16, %s2509_s18 }
  0xab   : > { %p2003_p2 = por %p2002_p1, %p2001_p5 }
  0xac   : > { %p1999_p0 = pneg %p1998_p11 }
  0xad   : > { %p2005_p13 = por %p2004_p8, %p2003_p2 }
  0xaf   : > { %p2006_p3 = pnand %p2005_p13, %p1999_p0 }
  0xb1   : > { %2009 = shalt.err (!%p2006_p3)
}
  0xb2   : > { %s2010_s24 = scalar_lea.vmem %s2504_s2, 1024  ;;  %s2225_s22 = smov [#allocation3]  }
  0xb3   : > { %p2011_p9 = scmp.ne.s32.totalorder %s2504_s2, %s2010_s24  ;;  %s2015_s21 = sshll.u32 %s2225_s22, 4  ;;  %s2016_s21 = int_to_ptr.vmem [resolvable:$false] %s2015_s21 }
  0xb4   : > { %s2017_s11 = scalar_lea.vmem %s2016_s21, 2048  ;;  %p2018_p4 = scmp.lt.s32.totalorder %s2504_s2, %s2016_s21 }
  0xb5   : > { %p2013_p11 = pnand %p2011_p9, %p1997_p10  ;;  %p2019_p5 = scmp.lt.s32.totalorder %s2017_s11, %s2010_s24 }
  0xb7   : > { %p2014_p12 = pneg %p2013_p11  ;;  %p2020_p1 = por %p2019_p5, %p2018_p4 }
  0xb9   : > { %p2021_p2 = pnand %p2020_p1, %p2014_p12 }
  0xbb   : > { %2024 = shalt.err (!%p2021_p2)
}
  0xbc   : > { %s2226_s6 = smov 128   ;;  %s3023_s16 = smov 4  }
  0xbd   : > { %s3024_s3 = smov 64   ;;  %s74_s4 = sadd.s32 1, %s2185_s26 }
  0xbe   : > { %1687 = dma.hbm_to_vmem [thread:$0]  (!%p2515_p7), %s2509_s18, 1024, %s2504_s2, %s2519_s7, %s2226_s6, %s3024_s3, %s3023_s16  }
  0xbf   : > { %p81_p4 = scmp.ne.s32.totalorder %s2185_s26, %s2181_s25  ;;  %p3025_p12 = scmp.eq.s32.totalorder %s2217_s10, 0 }
  0xc0   : > { %s2555_s14 = scalar_select %p72_p6, %s2185_s26, %s74_s4  }
  0xc1   : > { %p83_p10 = por %p81_p4, %p3025_p12  ;;  %s290_s5 = sand.u32 1, %s2217_s10  }
  0xc2   : > { %s292_s12 = sand.u32 1, %s2185_s26   ;;  %s1456_s24 = sshll.u32 %s2209_s8, 10 }
  0xc3   : > { %s1394_s19 = sshll.u32 %s292_s12, 6  ;;  %s2565_s11 = scalar_lea.hbm %s2967_s1, %s1456_s24 }
  0xc4   : > { %s294_s2 = scalar_lea.vmem [#allocation6], %s1394_s19  ;;  %p3026_p7 = scmp.lt.s32.totalorder %s2217_s10, 4 }
  0xc5   : > { %s301_s18 = sshll.u32 %s294_s2, 4  ;;  %s2575_s7 = scalar_lea.sflag [#allocation7], %s290_s5  ;;  %s2573_s18 = int_to_ptr.vmem [resolvable:$true] %s301_s18 }
  0xc6   : > { %p2569_p6 = pnand %p3026_p7, %p83_p10  ;;  %s2025_s6 = scalar_lea.hbm %s2565_s11, 1024 }
  0xc7   : > { %p2026_p0 = scmp.ne.s32.totalorder %s2565_s11, %s2025_s6  ;;  %s2030_s19 = scalar_lea.hbm %s2967_s1, 2048 }
  0xc8   : > { %p2027_p8 = pneg %p2569_p6  ;;  %p2031_p9 = scmp.lt.u32.totalorder %s2565_s11, %s2967_s1 }
  0xc9   : > { %p2032_p11 = scmp.lt.u32.totalorder %s2030_s19, %s2025_s6  ;;  %p2034_p1 = scmp.lt.u32.totalorder %s2025_s6, %s2565_s11 }
  0xca   : > { %p2028_p13 = pnand %p2027_p8, %p2026_p0 }
  0xcb   : > { %p2033_p5 = por %p2032_p11, %p2031_p9 }
  0xcc   : > { %p2029_p3 = pneg %p2028_p13 }
  0xcd   : > { %p2035_p2 = por %p2034_p1, %p2033_p5 }
  0xcf   : > { %p2036_p4 = pnand %p2035_p2, %p2029_p3 }
  0xd1   : > { %2039 = shalt.err (!%p2036_p4)
}
  0xd2   : > { %s2040_s5 = scalar_lea.vmem %s2573_s18, 1024  ;;  %s2227_s21 = smov [#allocation6]  }
  0xd3   : > { %p2041_p12 = scmp.ne.s32.totalorder %s2573_s18, %s2040_s5  ;;  %s2045_s2 = sshll.u32 %s2227_s21, 4  ;;  %s2046_s2 = int_to_ptr.vmem [resolvable:$false] %s2045_s2 }
  0xd4   : > { %s2047_s4 = scalar_lea.vmem %s2046_s2, 2048  ;;  %p2048_p0 = scmp.lt.s32.totalorder %s2573_s18, %s2046_s2 }
  0xd5   : > { %p2043_p10 = pnand %p2041_p12, %p2027_p8  ;;  %p2049_p13 = scmp.lt.s32.totalorder %s2047_s4, %s2040_s5 }
  0xd7   : > { %p2044_p7 = pneg %p2043_p10  ;;  %p2050_p9 = por %p2049_p13, %p2048_p0 }
  0xd9   : > { %p2051_p11 = pnand %p2050_p9, %p2044_p7 }
  0xdb   : > { %2054 = shalt.err (!%p2051_p11)
}
  0xdc   : > { %1690 = dma.hbm_to_vmem [thread:$0]  (!%p2569_p6), %s2565_s11, 1024, %s2573_s18, %s2575_s7, %s3024_s3, %s3024_s3, %s3023_s16  }
  0xdd   : > { %p3028_p8 = scmp.ne.s32.totalorder %s3013_s17, 0 }
  0xde   : > { %s315_s6 = sand.u32 (!%p3028_p8), 1, %s2193_s28   ;;  %p3029_p3 = scmp.ne.s32.totalorder (!%p3028_p8), %s3006_s13, 0 }
  0xdf   : > { %313 = sbr.rel (%p3028_p8) target bundleno = 1000 (0x3e8), region = 44  ;;  %s1398_s12 = sshll.u32 (!%p3028_p8), %s315_s6, 6 }
  0xe0   : > { %s316_s19 = scalar_lea.sflag (!%p3028_p8), [#allocation4], %s315_s6  ;;  %s2609_s24 = scalar_lea.vmem (!%p3028_p8), [#allocation3], %s1398_s12 }
  0xe6   : > { %2140 = dma.done.wait (%p3029_p3), %s316_s19, 1024  }
  0xe7   : > { %2142 = vsyncadd (%p3029_p3), %s316_s19, 4294966272  ;;  %s3030_s15 = sld [smem:[#allocation25_spill]]  ;;  %s3031_s22 = sld [smem:[#allocation26_spill]] }
  0xe8   : > { %s326_s16 = sand.u32 1, %s2181_s25  }
  0xe9   : > { %s1399_s3 = sshll.u32 %s326_s16, 6 }
  0xea   : > { %s2617_s11 = scalar_lea.vmem [#allocation6], %s1399_s3 }
  0xed   : > { %s324_s5 = sand.u32 1, %s3030_s15   ;;  %p3032_p6 = scmp.ne.s32.totalorder %s3031_s22, 0 }
  0xee   : > { %s325_s17 = scalar_lea.sflag [#allocation7], %s324_s5 }
  0xef   : > { %2144 = dma.done.wait (%p3032_p6), %s325_s17, 1024  }
  0xf0   : > { %2146 = vsyncadd (%p3032_p6), %s325_s17, 4294966272  ;;  %p3033_p5 = scmp.eq.s32.totalorder %s3030_s15, 0 }
  0xf2   : > { %2148 = dma.done.wait (%p3033_p5), [#allocation7], 1024   ;;  %p3034_p1 = pmov %p3033_p5 }
  0xf4   : > { %2150 = vsyncadd (%p3034_p1), [#allocation7], 4294966272  ;;  %p3035_p2 = pmov %p3034_p1 }
  0xf5   : > { %p3036_p4 = pmov %p3034_p1 }
  0xf6   : > { %2152 = dma.done.wait (%p3035_p2), [#allocation10], 32  }
  0xf7   : > { %2154 = vsyncadd (%p3036_p4), [#allocation10], 4294967264  ;;  %p3037_p12 = pmov %p3034_p1 }
  0xf8   : > { %p3038_p10 = pmov %p3034_p1 }
  0xf9   : > { %2156 = dma.done.wait (%p3037_p12), [#allocation13], 16  }
  0xfa   : > { %2158 = vsyncadd (%p3038_p10), [#allocation13], 4294967280  ;;  %s3039_s13 = sld [smem:[#allocation22_spill]]  ;;  %s3040_s2 = sld [smem:[#allocation23_spill]] }
 0x100   : > { %s375_s18 = sand.u32 1, %s3039_s13   ;;  %p1405_p7 = scmp.ne.s32.totalorder %s3040_s2, 0 }
 0x101   : > { %s1404_s7 = sshll.u32 %s375_s18, 6  ;;  %v2228_v0 = vmov (!%p1405_p7), 0.0  }
 0x102   : > { %s2638_s21 = scalar_lea.vmem [#allocation14], %s1404_s7  ;;  %385 = sbr.rel (%p1405_p7) target bundleno = 266 (0x10a), region = 72  ;;  %386 = vst [vmem:[#allocation2] sm:$0xff] (!%p1405_p7), %v2228_v0  ;;  %387 = vst [vmem:[#allocation2 + $0x8] sm:$0xff] (!%p1405_p7), %v2228_v0 }
 0x103   : > { %388 = vst [vmem:[#allocation2 + $0x10] sm:$0xff] (!%p1405_p7), %v2228_v0  ;;  %389 = vst [vmem:[#allocation2 + $0x18] sm:$0xff] (!%p1405_p7), %v2228_v0 }
 0x104   : > { %390 = vst [vmem:[#allocation2 + $0x20] sm:$0xff] (!%p1405_p7), %v2228_v0  ;;  %391 = vst [vmem:[#allocation2 + $0x28] sm:$0xff] (!%p1405_p7), %v2228_v0 }
 0x105   : > { %392 = vst [vmem:[#allocation2 + $0x30] sm:$0xff] (!%p1405_p7), %v2228_v0  ;;  %393 = vst [vmem:[#allocation2 + $0x38] sm:$0xff] (!%p1405_p7), %v2228_v0 }
 0x106   : > { %394 = vst [vmem:[#allocation2 + $0x40] sm:$0xff] (!%p1405_p7), %v2228_v0  ;;  %395 = vst [vmem:[#allocation2 + $0x48] sm:$0xff] (!%p1405_p7), %v2228_v0 }
 0x107   : > { %396 = vst [vmem:[#allocation2 + $0x50] sm:$0xff] (!%p1405_p7), %v2228_v0  ;;  %397 = vst [vmem:[#allocation2 + $0x58] sm:$0xff] (!%p1405_p7), %v2228_v0 }
 0x108   : > { %398 = vst [vmem:[#allocation2 + $0x60] sm:$0xff] (!%p1405_p7), %v2228_v0  ;;  %399 = vst [vmem:[#allocation2 + $0x68] sm:$0xff] (!%p1405_p7), %v2228_v0 }
 0x109   : > { %400 = vst [vmem:[#allocation2 + $0x70] sm:$0xff] %v2228_v0  ;;  %401 = vst [vmem:[#allocation2 + $0x78] sm:$0xff] %v2228_v0 }
 0x10a PF: > { %v1827_v1 = vld [vmem:[%s2617_s11] sm:$0xff]   ;;  %v1828_v2 = vld [vmem:[%s2617_s11 + $0x8] sm:$0xff]   ;;  %v1829_v3 = vld [vmem:[%s2617_s11 + $0x10] sm:$0xff]   ;;  %s3041_s4 = sld [smem:[#allocation23_spill]] }
 0x10b   : > { %1553 = vmatprep.subr.bf16.mxu0 %v1827_v1  ;;  %1617 = vmatprep.subr.bf16.mxu1 %v1827_v1  ;;  %v1830_v4 = vld [vmem:[%s2617_s11 + $0x18] sm:$0xff]   ;;  %v1835_v5 = vld [vmem:[%s2609_s24] sm:$0xff]   ;;  %v1832_v8 = vld [vmem:[%s2617_s11 + $0x28] sm:$0xff]  }
 0x10c   : > { %1554 = vmatpush3.bf16.msra.mxu0 %v1827_v1  ;;  %1625 = vmatpush3.bf16.msra.mxu1 %v1827_v1  ;;  %v1836_v6 = vld [vmem:[%s2609_s24 + $0x20] sm:$0xff]   ;;  %v1833_v9 = vld [vmem:[%s2617_s11 + $0x30] sm:$0xff]   ;;  %v1834_v10 = vld [vmem:[%s2617_s11 + $0x38] sm:$0xff]  }
 0x10d   : > { %1555 = vmatprep.subr.bf16.mxu0 %v1828_v2  ;;  %1618 = vmatprep.subr.bf16.mxu1 %v1828_v2  ;;  %v1831_v7 = vld [vmem:[%s2617_s11 + $0x20] sm:$0xff]   ;;  %v1837_v11 = vld [vmem:[%s2609_s24 + $0x8] sm:$0xff]   ;;  %v1839_v13 = vld [vmem:[%s2609_s24 + $0x10] sm:$0xff]  }
 0x10e   : > { %1569 = vmatprep.mubr.bf16.mxu0 %v1835_v5  ;;  %1577 = vmatprep.mubr.bf16.mxu1 %v1836_v6  ;;  %v1838_v12 = vld [vmem:[%s2609_s24 + $0x28] sm:$0xff]   ;;  %v1840_v14 = vld [vmem:[%s2609_s24 + $0x30] sm:$0xff]   ;;  %v1841_v15 = vld [vmem:[%s2609_s24 + $0x18] sm:$0xff]  }
 0x10f   : > { %v1842_v16 = vld [vmem:[%s2609_s24 + $0x38] sm:$0xff]   ;;  %v404_v17 = vld [vmem:[#allocation2 + $0x10] sm:$0xff]  ;;  %v402_v19 = vld [vmem:[#allocation2] sm:$0xff] }
 0x110   : > { %1556 = vmatpush3.bf16.msra.mxu0 %v1828_v2  ;;  %1626 = vmatpush3.bf16.msra.mxu1 %v1828_v2  ;;  %v412_v18 = vld [vmem:[#allocation2 + $0x50] sm:$0xff]  ;;  %v410_v20 = vld [vmem:[#allocation2 + $0x40] sm:$0xff]  ;;  %v405_v23 = vld [vmem:[#allocation2 + $0x18] sm:$0xff]  ;;  %p1422_p0 = scmp.ne.s32.totalorder %s3041_s4, 1 }
 0x111   : > { %1557 = vmatprep.subr.bf16.mxu0 %v1829_v3  ;;  %1619 = vmatprep.subr.bf16.mxu1 %v1829_v3  ;;  %v413_v24 = vld [vmem:[#allocation2 + $0x58] sm:$0xff]  ;;  %v403_v29 = vld [vmem:[#allocation2 + $0x8] sm:$0xff]  ;;  %v408_v41 = vld [vmem:[#allocation2 + $0x30] sm:$0xff] }
 0x112   : > { %v411_v30 = vld [vmem:[#allocation2 + $0x48] sm:$0xff]  ;;  %v416_v42 = vld [vmem:[#allocation2 + $0x70] sm:$0xff]  ;;  %v406_v43 = vld [vmem:[#allocation2 + $0x20] sm:$0xff] }
 0x113   : > { %v414_v44 = vld [vmem:[#allocation2 + $0x60] sm:$0xff]  ;;  %v409_v47 = vld [vmem:[#allocation2 + $0x38] sm:$0xff]  ;;  %v407_v53 = vld [vmem:[#allocation2 + $0x28] sm:$0xff] }
 0x114   : > { %1558 = vmatpush3.bf16.msra.mxu0 %v1829_v3  ;;  %1627 = vmatpush3.bf16.msra.mxu1 %v1829_v3  ;;  %v417_v48 = vld [vmem:[#allocation2 + $0x78] sm:$0xff]  ;;  %v415_v54 = vld [vmem:[#allocation2 + $0x68] sm:$0xff]  ;;  %v1843_v1 = vld [vmem:[#allocation8] sm:$0xff] (!%p1422_p0)  }
 0x115   : > { %1559 = vmatprep.subr.bf16.mxu0 %v1830_v4  ;;  %1620 = vmatprep.subr.bf16.mxu1 %v1830_v4  ;;  %v1844_v2 = vld [vmem:[#allocation8 + $0x8] sm:$0xff] (!%p1422_p0)   ;;  %v1845_v3 = vld [vmem:[#allocation8 + $0x10] sm:$0xff] (!%p1422_p0)  }
 0x118   : > { %1560 = vmatpush3.bf16.msra.mxu0 %v1830_v4  ;;  %1628 = vmatpush3.bf16.msra.mxu1 %v1830_v4  ;;  %v1846_v4 = vld [vmem:[#allocation8 + $0x18] sm:$0xff] (!%p1422_p0)  }
 0x119   : > { %1561 = vmatprep.subr.bf16.mxu0 %v1831_v7  ;;  %1621 = vmatprep.subr.bf16.mxu1 %v1831_v7 }
 0x11c   : > { %1562 = vmatpush3.bf16.msra.mxu0 %v1831_v7  ;;  %1629 = vmatpush3.bf16.msra.mxu1 %v1831_v7 }
 0x11d   : > { %1563 = vmatprep.subr.bf16.mxu0 %v1832_v8  ;;  %1622 = vmatprep.subr.bf16.mxu1 %v1832_v8 }
 0x120   : > { %1564 = vmatpush3.bf16.msra.mxu0 %v1832_v8  ;;  %1630 = vmatpush3.bf16.msra.mxu1 %v1832_v8 }
 0x121   : > { %1565 = vmatprep.subr.bf16.mxu0 %v1833_v9  ;;  %1623 = vmatprep.subr.bf16.mxu1 %v1833_v9 }
 0x124   : > { %1566 = vmatpush3.bf16.msra.mxu0 %v1833_v9  ;;  %1631 = vmatpush3.bf16.msra.mxu1 %v1833_v9 }
 0x125   : > { %1567 = vmatprep.subr.bf16.mxu0 %v1834_v10  ;;  %1624 = vmatprep.subr.bf16.mxu1 %v1834_v10 }
 0x128   : > { %1568 = vmatpush3.bf16.msra.mxu0 %v1834_v10  ;;  %1632 = vmatpush3.bf16.msra.mxu1 %v1834_v10 }
 0x129   : > { %1585 = vmatprep.subr.bf16.mxu0 (!%p1422_p0), %v1843_v1  ;;  %1633 = vmatprep.subr.bf16.mxu1 (!%p1422_p0), %v1843_v1 }
 0x12b   : > { %1570 = vmatmul.mubr.bf16.vlgmr.msra.gmra.mrb[0].mxu0 %v1837_v11  ;;  %1578 = vmatmul.mubr.bf16.vlgmr.msra.gmra.mrb[0].mxu1 %v1838_v12  ;;  %v1847_v11 = vld [vmem:[#allocation8 + $0x20] sm:$0xff] (!%p1422_p0)   ;;  %v1848_v12 = vld [vmem:[#allocation8 + $0x28] sm:$0xff] (!%p1422_p0)  }
 0x12c   : > { %1573 = vmatprep.mubr.bf16.mxu0 %v1839_v13  ;;  %1581 = vmatprep.mubr.bf16.mxu1 %v1840_v14  ;;  %v1849_v13 = vld [vmem:[#allocation8 + $0x30] sm:$0xff] (!%p1422_p0)   ;;  %v1850_v14 = vld [vmem:[#allocation8 + $0x38] sm:$0xff] (!%p1422_p0)  }
 0x12d   : > { %1586 = vmatpush3.bf16.msra.mxu0 (!%p1422_p0), %v1843_v1  ;;  %1641 = vmatpush3.bf16.msra.mxu1 (!%p1422_p0), %v1843_v1 }
 0x12e   : > { %1587 = vmatprep.subr.bf16.mxu0 (!%p1422_p0), %v1844_v2  ;;  %1634 = vmatprep.subr.bf16.mxu1 (!%p1422_p0), %v1844_v2 }
 0x131   : > { %1588 = vmatpush3.bf16.msra.mxu0 (!%p1422_p0), %v1844_v2  ;;  %1642 = vmatpush3.bf16.msra.mxu1 (!%p1422_p0), %v1844_v2 }
 0x132   : > { %1589 = vmatprep.subr.bf16.mxu0 (!%p1422_p0), %v1845_v3  ;;  %1635 = vmatprep.subr.bf16.mxu1 (!%p1422_p0), %v1845_v3 }
 0x133   : > { %1574 = vmatmul.mubr.bf16.gmra.mrb[4].mxu0 %v1841_v15  ;;  %1582 = vmatmul.mubr.bf16.gmra.mrb[4].mxu1 %v1842_v16 }
 0x135   : > { %1590 = vmatpush3.bf16.msra.mxu0 (!%p1422_p0), %v1845_v3  ;;  %1643 = vmatpush3.bf16.msra.mxu1 (!%p1422_p0), %v1845_v3 }
 0x136   : > { %1591 = vmatprep.subr.bf16.mxu0 (!%p1422_p0), %v1846_v4  ;;  %1636 = vmatprep.subr.bf16.mxu1 (!%p1422_p0), %v1846_v4 }
 0x139   : > { %1592 = vmatpush3.bf16.msra.mxu0 (!%p1422_p0), %v1846_v4  ;;  %1644 = vmatpush3.bf16.msra.mxu1 (!%p1422_p0), %v1846_v4 }
 0x13a   : > { %1593 = vmatprep.subr.bf16.mxu0 (!%p1422_p0), %v1847_v11  ;;  %1637 = vmatprep.subr.bf16.mxu1 (!%p1422_p0), %v1847_v11 }
 0x13d   : > { %1594 = vmatpush3.bf16.msra.mxu0 (!%p1422_p0), %v1847_v11  ;;  %1645 = vmatpush3.bf16.msra.mxu1 (!%p1422_p0), %v1847_v11 }
 0x13e   : > { %1595 = vmatprep.subr.bf16.mxu0 (!%p1422_p0), %v1848_v12  ;;  %1638 = vmatprep.subr.bf16.mxu1 (!%p1422_p0), %v1848_v12 }
 0x141   : > { %1596 = vmatpush3.bf16.msra.mxu0 (!%p1422_p0), %v1848_v12  ;;  %1646 = vmatpush3.bf16.msra.mxu1 (!%p1422_p0), %v1848_v12 }
 0x142   : > { %1597 = vmatprep.subr.bf16.mxu0 (!%p1422_p0), %v1849_v13  ;;  %1639 = vmatprep.subr.bf16.mxu1 (!%p1422_p0), %v1849_v13 }
 0x145   : > { %1598 = vmatpush3.bf16.msra.mxu0 (!%p1422_p0), %v1849_v13  ;;  %1647 = vmatpush3.bf16.msra.mxu1 (!%p1422_p0), %v1849_v13 }
 0x146   : > { %1599 = vmatprep.subr.bf16.mxu0 (!%p1422_p0), %v1850_v14  ;;  %1640 = vmatprep.subr.bf16.mxu1 (!%p1422_p0), %v1850_v14 }
 0x149   : > { %1600 = vmatpush3.bf16.msra.mxu0 (!%p1422_p0), %v1850_v14  ;;  %1648 = vmatpush3.bf16.msra.mxu1 (!%p1422_p0), %v1850_v14 }
 0x1fe   : > { %v1571_v21 = vpop.f32.mrb[0].mxu0  ;;  %v1579_v22 = vpop.f32.mrb[0].mxu1 }
 0x1ff   : > { %v645_v25 = vadd.f32 %v1571_v21, %v404_v17  ;;  %v653_v26 = vadd.f32 %v1579_v22, %v412_v18  ;;  %v580_v27 = vpop.f32.mrb[1].mxu0  ;;  %v612_v28 = vpop.f32.mrb[1].mxu1 }
 0x200   : > { %v643_v31 = vadd.f32 %v580_v27, %v402_v19  ;;  %v651_v32 = vadd.f32 %v612_v28, %v410_v20  ;;  %v1572_v33 = vpop.f32.mrb[2].mxu0  ;;  %v1580_v34 = vpop.f32.mrb[2].mxu1 }
 0x201   : > { %661 = vst [vmem:[#allocation2 + $0x10] sm:$0xff] %v645_v25  ;;  %669 = vst [vmem:[#allocation2 + $0x50] sm:$0xff] %v653_v26  ;;  %v646_v35 = vadd.f32 %v1572_v33, %v405_v23  ;;  %v654_v36 = vadd.f32 %v1580_v34, %v413_v24  ;;  %v583_v37 = vpop.f32.mrb[3].mxu0  ;;  %v615_v38 = vpop.f32.mrb[3].mxu1  ;;  %v1423_v33 = vld [vmem:[#allocation9] ss:$0 sm:$0xff] (!%p1422_p0) }
 0x202   : > { %659 = vst [vmem:[#allocation2] sm:$0xff] %v643_v31  ;;  %667 = vst [vmem:[#allocation2 + $0x40] sm:$0xff] %v651_v32  ;;  %v644_v39 = vadd.f32 %v583_v37, %v403_v29  ;;  %v652_v40 = vadd.f32 %v615_v38, %v411_v30 }
 0x203   : > { %662 = vst [vmem:[#allocation2 + $0x18] sm:$0xff] %v646_v35  ;;  %670 = vst [vmem:[#allocation2 + $0x58] sm:$0xff] %v654_v36 }
 0x204   : > { %660 = vst [vmem:[#allocation2 + $0x8] sm:$0xff] %v644_v39  ;;  %668 = vst [vmem:[#allocation2 + $0x48] sm:$0xff] %v652_v40 }
 0x206   : > { %v1575_v45 = vpop.f32.mrb[4].mxu0  ;;  %v1583_v46 = vpop.f32.mrb[4].mxu1  ;;  %678 = sbr.rel (%p1422_p0) target bundleno = 972 (0x3cc), region = 76 }
 0x207   : > { %v649_v49 = vadd.f32 %v1575_v45, %v408_v41  ;;  %v657_v50 = vadd.f32 %v1583_v46, %v416_v42  ;;  %v596_v51 = vpop.f32.mrb[5].mxu0  ;;  %v628_v52 = vpop.f32.mrb[5].mxu1 }
 0x208   : > { %v647_v55 = vadd.f32 %v596_v51, %v406_v43  ;;  %v655_v56 = vadd.f32 %v628_v52, %v414_v44  ;;  %v1576_v57 = vpop.f32.mrb[6].mxu0  ;;  %v1584_v58 = vpop.f32.mrb[6].mxu1  ;;  %v681_v15 = vld [vmem:[#allocation2 + $0x10] sm:$0xff] (!%p1422_p0) }
 0x209   : > { %665 = vst [vmem:[#allocation2 + $0x30] sm:$0xff] %v649_v49  ;;  %673 = vst [vmem:[#allocation2 + $0x70] sm:$0xff] %v657_v50  ;;  %v650_v59 = vadd.f32 %v1576_v57, %v409_v47  ;;  %v658_v60 = vadd.f32 %v1584_v58, %v417_v48  ;;  %v599_v61 = vpop.f32.mrb[7].mxu0  ;;  %v631_v62 = vpop.f32.mrb[7].mxu1  ;;  %v679_v5 = vld [vmem:[#allocation2] sm:$0xff] (!%p1422_p0)  ;;  %v689_v17 = vld [vmem:[#allocation2 + $0x50] sm:$0xff] (!%p1422_p0) }
 0x20a   : > { %663 = vst [vmem:[#allocation2 + $0x20] sm:$0xff] %v647_v55  ;;  %671 = vst [vmem:[#allocation2 + $0x60] sm:$0xff] %v655_v56  ;;  %v648_v63 = vadd.f32 %v599_v61, %v407_v53  ;;  %v656_v0 = vadd.f32 %v631_v62, %v415_v54  ;;  %v687_v7 = vld [vmem:[#allocation2 + $0x40] sm:$0xff] (!%p1422_p0)  ;;  %v682_v16 = vld [vmem:[#allocation2 + $0x18] sm:$0xff] (!%p1422_p0) }
 0x20b   : > { %666 = vst [vmem:[#allocation2 + $0x38] sm:$0xff] %v650_v59  ;;  %674 = vst [vmem:[#allocation2 + $0x78] sm:$0xff] %v658_v60  ;;  %v680_v6 = vld [vmem:[#allocation2 + $0x8] sm:$0xff] (!%p1422_p0)  ;;  %v690_v18 = vld [vmem:[#allocation2 + $0x58] sm:$0xff] (!%p1422_p0)  ;;  %v696_v23 = vpack.c.bf16 (!%p1422_p0), %v682_v16, %v681_v15 }
 0x20c   : > { %664 = vst [vmem:[#allocation2 + $0x28] sm:$0xff] %v648_v63  ;;  %672 = vst [vmem:[#allocation2 + $0x68] sm:$0xff] %v656_v0  ;;  %v695_v8 = vpack.c.bf16 (!%p1422_p0), %v680_v6, %v679_v5  ;;  %v688_v9 = vld [vmem:[#allocation2 + $0x48] sm:$0xff] (!%p1422_p0)  ;;  %v700_v24 = vpack.c.bf16 (!%p1422_p0), %v690_v18, %v689_v17 }
 0x20d   : > { %v699_v10 = vpack.c.bf16 %v688_v9, %v687_v7 }
 0x20e   : > { %1601 = vmatprep.mubr.bf16.mxu0 %v695_v8 }
 0x20f   : > { %1609 = vmatprep.mubr.bf16.mxu1 %v699_v10  ;;  %1602 = vmatmul.mubr.bf16.vlgmr.msra.gmra.mrb[0].mxu0 %v696_v23 }
 0x210   : > { %1610 = vmatmul.mubr.bf16.vlgmr.msra.gmra.mrb[0].mxu1 %v700_v24  ;;  %v685_v27 = vld [vmem:[#allocation2 + $0x30] sm:$0xff] }
 0x211   : > { %v683_v19 = vld [vmem:[#allocation2 + $0x20] sm:$0xff]  ;;  %v693_v29 = vld [vmem:[#allocation2 + $0x70] sm:$0xff] }
 0x212   : > { %v691_v21 = vld [vmem:[#allocation2 + $0x60] sm:$0xff]  ;;  %v686_v28 = vld [vmem:[#allocation2 + $0x38] sm:$0xff] }
 0x213   : > { %v684_v20 = vld [vmem:[#allocation2 + $0x28] sm:$0xff]  ;;  %v694_v30 = vld [vmem:[#allocation2 + $0x78] sm:$0xff]  ;;  %v698_v31 = vpack.c.bf16 %v686_v28, %v685_v27 }
 0x214   : > { %v692_v22 = vld [vmem:[#allocation2 + $0x68] sm:$0xff]  ;;  %v697_v25 = vpack.c.bf16 %v684_v20, %v683_v19  ;;  %v702_v32 = vpack.c.bf16 %v694_v30, %v693_v29 }
 0x215   : > { %v701_v26 = vpack.c.bf16 %v692_v22, %v691_v21 }
 0x216   : > { %1605 = vmatprep.mubr.bf16.mxu0 %v697_v25 }
 0x217   : > { %1613 = vmatprep.mubr.bf16.mxu1 %v701_v26  ;;  %1606 = vmatmul.mubr.bf16.gmra.mrb[4].mxu0 %v698_v31 }
 0x218   : > { %1614 = vmatmul.mubr.bf16.gmra.mrb[4].mxu1 %v702_v32 }
 0x2e2   : > { %v1603_v34 = vpop.f32.mrb[0].mxu0 }
 0x2e3   : > { %v1611_v35 = vpop.f32.mrb[0].mxu1  ;;  %v2658_v36 = vadd.f32 %v1603_v34, %v1423_v33  ;;  %v808_v38 = vpop.f32.mrb[1].mxu0 }
 0x2e4   : > { %v2660_v37 = vadd.f32 %v1611_v35, %v1423_v33  ;;  %v840_v39 = vpop.f32.mrb[1].mxu1  ;;  %v1604_v40 = vpop.f32.mrb[2].mxu0  ;;  %v2664_v44 = vadd.f32 %v1423_v33, %v808_v38 }
 0x2e5   : > { %v1612_v41 = vpop.f32.mrb[2].mxu1  ;;  %877 = vadd.xlane.f32.xlu1 %v2658_v36  ;;  %v811_v43 = vpop.f32.mrb[3].mxu0  ;;  %v2666_v45 = vadd.f32 %v1604_v40, %v1423_v33  ;;  %v2670_v48 = vadd.f32 %v1423_v33, %v840_v39  ;;  %v923_v57 = vmul.f32 %v2658_v36, %v2658_v36 }
 0x2e6   : > { %893 = vadd.xlane.f32.xlu0 %v2660_v37  ;;  %v843_v42 = vpop.f32.mrb[3].mxu1  ;;  %v2672_v49 = vadd.f32 %v1612_v41, %v1423_v33  ;;  %v931_v59 = vmul.f32 %v2660_v37, %v2660_v37  ;;  %v2685_v60 = vadd.f32 %v1423_v33, %v811_v43  ;;  %v921_v63 = vmul.f32 %v2664_v44, %v2664_v44 }
 0x2e7   : > { %v2676_v56 = vadd.f32 %v1423_v33, %v843_v42  ;;  %v924_v58 = vmul.f32 %v2666_v45, %v2666_v45  ;;  %v929_v1 = vmul.f32 %v2670_v48, %v2670_v48 }
 0x2e8   : > { %v932_v61 = vmul.f32 %v2672_v49, %v2672_v49  ;;  %v922_v62 = vmul.f32 %v2685_v60, %v2685_v60 }
 0x2e9   : > { %879 = vadd.xlane.f32.xlu1 %v2666_v45  ;;  %v930_v0 = vmul.f32 %v2676_v56, %v2676_v56 }
 0x2ea   : > { %873 = vadd.xlane.f32.xlu0 %v2664_v44  ;;  %v1607_v46 = vpop.f32.mrb[4].mxu0 }
 0x2eb   : > { %v1615_v47 = vpop.f32.mrb[4].mxu1  ;;  %v824_v50 = vpop.f32.mrb[5].mxu0  ;;  %v2698_v2 = vadd.f32 %v1607_v46, %v1423_v33 }
 0x2ec   : > { %v856_v51 = vpop.f32.mrb[5].mxu1  ;;  %v1608_v52 = vpop.f32.mrb[6].mxu0  ;;  %v2704_v4 = vadd.f32 %v1615_v47, %v1423_v33  ;;  %v2710_v6 = vadd.f32 %v1423_v33, %v824_v50 }
 0x2ed   : > { %v1616_v53 = vpop.f32.mrb[6].mxu1  ;;  %895 = vadd.xlane.f32.xlu1 %v2672_v49  ;;  %v827_v54 = vpop.f32.mrb[7].mxu0  ;;  %v2700_v3 = vadd.f32 %v1608_v52, %v1423_v33  ;;  %v2716_v8 = vadd.f32 %v1423_v33, %v856_v51  ;;  %v927_v11 = vmul.f32 %v2698_v2, %v2698_v2 }
 0x2ee   : > { %889 = vadd.xlane.f32.xlu0 %v2670_v48  ;;  %v859_v55 = vpop.f32.mrb[7].mxu1  ;;  %v2706_v5 = vadd.f32 %v1616_v53, %v1423_v33  ;;  %v2712_v7 = vadd.f32 %v1423_v33, %v827_v54  ;;  %v925_v13 = vmul.f32 %v2710_v6, %v2710_v6  ;;  %v935_v17 = vmul.f32 %v2704_v4, %v2704_v4 }
 0x2ef   : > { %v2718_v9 = vadd.f32 %v1423_v33, %v859_v55  ;;  %v928_v10 = vmul.f32 %v2700_v3, %v2700_v3  ;;  %v933_v15 = vmul.f32 %v2716_v8, %v2716_v8 }
 0x2f0   : > { %v926_v12 = vmul.f32 %v2712_v7, %v2712_v7  ;;  %v936_v16 = vmul.f32 %v2706_v5, %v2706_v5 }
 0x2f1   : > { %891 = vadd.xlane.f32.xlu1 %v2676_v56  ;;  %v934_v14 = vmul.f32 %v2718_v9, %v2718_v9 }
 0x2f2   : > { %941 = vadd.xlane.f32.xlu0 %v923_v57 }
 0x2f5   : > { %943 = vadd.xlane.f32.xlu1 %v924_v58 }
 0x2f6   : > { %957 = vadd.xlane.f32.xlu0 %v931_v59 }
 0x2f9   : > { %959 = vadd.xlane.f32.xlu1 %v932_v61 }
 0x2fa   : > { %875 = vadd.xlane.f32.xlu0 %v2685_v60 }
 0x2fd   : > { %939 = vadd.xlane.f32.xlu1 %v922_v62 }
 0x2fe   : > { %937 = vadd.xlane.f32.xlu0 %v921_v63 }
 0x301   : > { %955 = vadd.xlane.f32.xlu1 %v930_v0 }
 0x302   : > { %953 = vadd.xlane.f32.xlu0 %v929_v1 }
 0x305   : > { %887 = vadd.xlane.f32.xlu1 %v2700_v3 }
 0x306   : > { %885 = vadd.xlane.f32.xlu0 %v2698_v2 }
 0x309   : > { %903 = vadd.xlane.f32.xlu1 %v2706_v5 }
 0x30a   : > { %901 = vadd.xlane.f32.xlu0 %v2704_v4 }
 0x30d   : > { %883 = vadd.xlane.f32.xlu1 %v2712_v7 }
 0x30e   : > { %881 = vadd.xlane.f32.xlu0 %v2710_v6 }
 0x311   : > { %899 = vadd.xlane.f32.xlu1 %v2718_v9 }
 0x312   : > { %897 = vadd.xlane.f32.xlu0 %v2716_v8 }
 0x315   : > { %951 = vadd.xlane.f32.xlu1 %v928_v10 }
 0x316   : > { %949 = vadd.xlane.f32.xlu0 %v927_v11 }
 0x319   : > { %947 = vadd.xlane.f32.xlu1 %v926_v12 }
 0x31a   : > { %945 = vadd.xlane.f32.xlu0 %v925_v13 }
 0x31d   : > { %963 = vadd.xlane.f32.xlu1 %v934_v14 }
 0x31e   : > { %961 = vadd.xlane.f32.xlu0 %v933_v15 }
 0x321   : > { %967 = vadd.xlane.f32.xlu1 %v936_v16 }
 0x322   : > { %965 = vadd.xlane.f32.xlu0 %v935_v17  ;;  %v2767_v17 = vld [vmem:[#allocation11] ss:$0 sm:$0xff] }
 0x372   : > { %v878_v19 = vpop.xlane.xlu1 %877 }
 0x373   : > { %v894_v18 = vpop.xlane.xlu0 %893  ;;  %v907_v24 = vmul.f32 0.015625, %v878_v19 }
 0x374   : > { %v2738_v25 = vmul.f32 0.015625, %v894_v18 }
 0x375   : > { %v987_v28 = vmul.f32 %v907_v24, %v907_v24  ;;  %v1019_v14 = vsub.f32 %v2658_v36, %v907_v24 }
 0x376   : > { %v880_v20 = vpop.xlane.xlu1 %879  ;;  %v995_v32 = vmul.f32 %v2738_v25, %v2738_v25 }
 0x377   : > { %v874_v21 = vpop.xlane.xlu0 %873  ;;  %v2740_v29 = vmul.f32 0.015625, %v880_v20 }
 0x378   : > { %v2748_v46 = vmul.f32 0.015625, %v874_v21 }
 0x379   : > { %v988_v38 = vmul.f32 %v2740_v29, %v2740_v29  ;;  %v1020_v36 = vsub.f32 %v2666_v45, %v2740_v29 }
 0x37a   : > { %v896_v22 = vpop.xlane.xlu1 %895  ;;  %v985_v58 = vmul.f32 %v2748_v46, %v2748_v46 }
 0x37b   : > { %v890_v23 = vpop.xlane.xlu0 %889  ;;  %v2744_v33 = vmul.f32 0.015625, %v896_v22 }
 0x37c   : > { %v2756_v59 = vmul.f32 0.015625, %v890_v23 }
 0x37d   : > { %v996_v47 = vmul.f32 %v2744_v33, %v2744_v33  ;;  %v1028_v45 = vsub.f32 %v2672_v49, %v2744_v33 }
 0x37e   : > { %v892_v26 = vpop.xlane.xlu1 %891  ;;  %v993_v15 = vmul.f32 %v2756_v59, %v2756_v59 }
 0x37f   : > { %v942_v27 = vpop.xlane.xlu0 %941  ;;  %v2758_v61 = vmul.f32 0.015625, %v892_v26 }
 0x380   : > { %v971_v30 = vmul.f32 0.015625, %v942_v27 }
 0x381   : > { %v994_v16 = vmul.f32 %v2758_v61, %v2758_v61 }
 0x382   : > { %v1003_v31 = vsub.f32 %v971_v30, %v987_v28  ;;  %v944_v34 = vpop.xlane.xlu1 %943 }
 0x383   : > { %v958_v35 = vpop.xlane.xlu0 %957  ;;  %v972_v40 = vmul.f32 0.015625, %v944_v34 }
 0x384   : > { %v1035_v39 = vadd.f32 1e-05, %v1003_v31  ;;  %v979_v41 = vmul.f32 0.015625, %v958_v35  ;;  %v1027_v35 = vsub.f32 %v2660_v37, %v2738_v25 }
 0x385   : > { %v1004_v42 = vsub.f32 %v972_v40, %v988_v38  ;;  %v2774_v38 = vld [vmem:[#allocation12] ss:$0 sm:$0xff] }
 0x386   : > { %1851 = vrsqrt.f32 %v1035_v39  ;;  %v1011_v43 = vsub.f32 %v979_v41, %v995_v32  ;;  %v960_v50 = vpop.xlane.xlu1 %959 }
 0x387   : > { %v876_v51 = vpop.xlane.xlu0 %875  ;;  %v1036_v52 = vadd.f32 1e-05, %v1004_v42  ;;  %v980_v54 = vmul.f32 0.015625, %v960_v50 }
 0x388   : > { %v1043_v53 = vadd.f32 1e-05, %v1011_v43  ;;  %v2752_v55 = vmul.f32 0.015625, %v876_v51 }
 0x389   : > { %1853 = vrsqrt.f32 %v1036_v52  ;;  %v1012_v57 = vsub.f32 %v980_v54, %v996_v47 }
 0x38a   : > { %1855 = vrsqrt.f32 %v1043_v53  ;;  %v940_v62 = vpop.xlane.xlu1 %939  ;;  %v986_v1 = vmul.f32 %v2752_v55, %v2752_v55  ;;  %v1018_v54 = vsub.f32 %v2685_v60, %v2752_v55  ;;  %v1026_v60 = vsub.f32 %v2676_v56, %v2758_v61 }
 0x38b   : > { %v938_v63 = vpop.xlane.xlu0 %937  ;;  %v1044_v0 = vadd.f32 1e-05, %v1012_v57  ;;  %v970_v10 = vmul.f32 0.015625, %v940_v62 }
 0x38c   : > { %v969_v11 = vmul.f32 0.015625, %v938_v63 }
 0x38d   : > { %1857 = vrsqrt.f32 %v1044_v0  ;;  %v1002_v12 = vsub.f32 %v970_v10, %v986_v1  ;;  %v1017_v1 = vsub.f32 %v2664_v44, %v2748_v46 }
 0x38e   : > { %v1001_v13 = vsub.f32 %v969_v11, %v985_v58  ;;  %v956_v18 = vpop.xlane.xlu1 %955 }
 0x38f   : > { %v954_v19 = vpop.xlane.xlu0 %953  ;;  %v1034_v21 = vadd.f32 1e-05, %v1002_v12  ;;  %v978_v23 = vmul.f32 0.015625, %v956_v18 }
 0x390   : > { %v1852_v20 = vpop.eup %1851  ;;  %v1033_v22 = vadd.f32 1e-05, %v1001_v13  ;;  %v977_v26 = vmul.f32 0.015625, %v954_v19 }
 0x391   : > { %v1067_v27 = vmul.f32 %v1852_v20, %v1019_v14  ;;  %1859 = vrsqrt.f32 %v1034_v21  ;;  %v1010_v28 = vsub.f32 %v978_v23, %v994_v16  ;;  %v1025_v21 = vsub.f32 %v2670_v48, %v2756_v59 }
 0x392   : > { %v1009_v30 = vsub.f32 %v977_v26, %v993_v15  ;;  %1861 = vrsqrt.f32 %v1033_v22  ;;  %v888_v31 = vpop.xlane.xlu1 %887 }
 0x393   : > { %v1089_v24 = vmul.f32 %v2767_v17, %v1067_v27  ;;  %v886_v32 = vpop.xlane.xlu0 %885  ;;  %v1854_v34 = vpop.eup %1853  ;;  %v1042_v39 = vadd.f32 1e-05, %v1010_v28  ;;  %v2795_v14 = vmul.f32 0.015625, %v888_v31 }
 0x394   : > { %v1041_v40 = vadd.f32 1e-05, %v1009_v30  ;;  %v1856_v41 = vpop.eup %1855  ;;  %v1068_v42 = vmul.f32 %v1854_v34, %v1020_v36  ;;  %v2799_v19 = vmul.f32 0.015625, %v886_v32 }
 0x395   : > { %v1075_v43 = vmul.f32 %v1856_v41, %v1027_v35  ;;  %1863 = vrsqrt.f32 %v1042_v39  ;;  %v1111_v29 = vadd.f32 %v2774_v38, %v1089_v24  ;;  %v992_v30 = vmul.f32 %v2795_v14, %v2795_v14 }
 0x396   : > { %v1090_v47 = vmul.f32 %v2767_v17, %v1068_v42  ;;  %1865 = vrsqrt.f32 %v1041_v40  ;;  %v2780_v50 = vpop.xlane.xlu1 %903  ;;  %v991_v48 = vmul.f32 %v2799_v19, %v2799_v19 }
 0x397   : > { %v2782_v51 = vpop.xlane.xlu0 %901  ;;  %v1858_v37 = vpop.eup %1857  ;;  %v1097_v25 = vmul.f32 %v2767_v17, %v1075_v43  ;;  %v1127_v49 = vmax.f32 %v1111_v29, 0.0 }
 0x398   : > { %v1112_v52 = vadd.f32 %v2774_v38, %v1090_v47  ;;  %v1076_v53 = vmul.f32 %v1858_v37, %v1028_v45 }
 0x399   : > { %v1119_v57 = vadd.f32 %v2774_v38, %v1097_v25 }
 0x39a   : > { %v1128_v33 = vmax.f32 %v1112_v52, 0.0  ;;  %v1098_v58 = vmul.f32 %v2767_v17, %v1076_v53  ;;  %v884_v62 = vpop.xlane.xlu1 %883 }
 0x39b   : > { %v882_v63 = vpop.xlane.xlu0 %881  ;;  %v1860_v0 = vpop.eup %1859  ;;  %v1135_v15 = vmax.f32 %v1119_v57, 0.0  ;;  %v2812_v59 = vmul.f32 0.015625, %v884_v62 }
 0x39c   : > { %v1862_v10 = vpop.eup %1861  ;;  %v1482_v11 = vpack.c.bf16 %v1128_v33, %v1127_v49  ;;  %v1120_v12 = vadd.f32 %v2774_v38, %v1098_v58  ;;  %v1066_v13 = vmul.f32 %v1860_v0, %v1018_v54  ;;  %v2816_v42 = vmul.f32 0.015625, %v882_v63 }
 0x39d   : > { %v1065_v55 = vmul.f32 %v1862_v10, %v1017_v1  ;;  %v990_v25 = vmul.f32 %v2812_v59, %v2812_v59  ;;  %v2829_v10 = vmul.f32 0.015625, %v2780_v50 }
 0x39e   : > { %1514 = vst [vmem:[%s2638_s21 + $0x8] sm:$0xff] %v1482_v11   ;;  %v1136_v16 = vmax.f32 %v1120_v12, 0.0  ;;  %v1088_v18 = vmul.f32 %v2767_v17, %v1066_v13  ;;  %v900_v44 = vpop.xlane.xlu1 %899  ;;  %v989_v63 = vmul.f32 %v2816_v42, %v2816_v42  ;;  %v2832_v12 = vmul.f32 0.015625, %v2782_v51 }
 0x39f   : > { %v898_v46 = vpop.xlane.xlu0 %897  ;;  %v1864_v20 = vpop.eup %1863  ;;  %v1087_v22 = vmul.f32 %v2767_v17, %v1065_v55  ;;  %v2821_v52 = vmul.f32 0.015625, %v900_v44  ;;  %v1000_v51 = vmul.f32 %v2829_v10, %v2829_v10 }
 0x3a0   : > { %v1866_v56 = vpop.eup %1865  ;;  %v1502_v61 = vpack.c.bf16 %v1136_v16, %v1135_v15  ;;  %v1110_v23 = vadd.f32 %v2774_v38, %v1088_v18  ;;  %v1074_v26 = vmul.f32 %v1864_v20, %v1026_v60  ;;  %v2823_v53 = vmul.f32 0.015625, %v898_v46 }
 0x3a1   : > { %v1109_v27 = vadd.f32 %v2774_v38, %v1087_v22  ;;  %v1073_v28 = vmul.f32 %v1866_v56, %v1025_v21  ;;  %v998_v13 = vmul.f32 %v2821_v52, %v2821_v52  ;;  %v999_v22 = vmul.f32 %v2832_v12, %v2832_v12 }
 0x3a2   : > { %1518 = vst [vmem:[%s2638_s21 + $0x28] sm:$0xff] %v1502_v61   ;;  %v1126_v36 = vmax.f32 %v1110_v23, 0.0  ;;  %v1096_v24 = vmul.f32 %v2767_v17, %v1074_v26  ;;  %v952_v31 = vpop.xlane.xlu1 %951  ;;  %v997_v16 = vmul.f32 %v2823_v53, %v2823_v53 }
 0x3a3   : > { %v950_v32 = vpop.xlane.xlu0 %949  ;;  %v1125_v34 = vmax.f32 %v1109_v27, 0.0  ;;  %v1095_v35 = vmul.f32 %v2767_v17, %v1073_v28  ;;  %v976_v39 = vmul.f32 0.015625, %v952_v31  ;;  %v1023_v31 = vsub.f32 %v2698_v2, %v2799_v19 }
 0x3a4   : > { %v975_v40 = vmul.f32 0.015625, %v950_v32  ;;  %v1118_v41 = vadd.f32 %v2774_v38, %v1096_v24  ;;  %v1024_v24 = vsub.f32 %v2700_v3, %v2795_v14  ;;  %v1021_v3 = vsub.f32 %v2710_v6, %v2816_v42 }
 0x3a5   : > { %v1477_v43 = vpack.c.bf16 %v1126_v36, %v1125_v34  ;;  %v1117_v45 = vadd.f32 %v2774_v38, %v1095_v35  ;;  %v1008_v29 = vsub.f32 %v976_v39, %v992_v30  ;;  %v1029_v6 = vsub.f32 %v2716_v8, %v2823_v53 }
 0x3a6   : > { %v1007_v47 = vsub.f32 %v975_v40, %v991_v48  ;;  %v1134_v37 = vmax.f32 %v1118_v41, 0.0  ;;  %v948_v54 = vpop.xlane.xlu1 %947  ;;  %v1022_v41 = vsub.f32 %v2712_v7, %v2812_v59  ;;  %v1031_v8 = vsub.f32 %v2704_v4, %v2832_v12 }
 0x3a7   : > { %v946_v49 = vpop.xlane.xlu0 %945  ;;  %1478 = vst [vmem:[%s2638_s21] sm:$0xff] %v1477_v43   ;;  %v1133_v33 = vmax.f32 %v1117_v45, 0.0  ;;  %v1040_v57 = vadd.f32 1e-05, %v1008_v29  ;;  %v974_v62 = vmul.f32 0.015625, %v948_v54 }
 0x3a8   : > { %v1039_v58 = vadd.f32 1e-05, %v1007_v47  ;;  %v973_v0 = vmul.f32 0.015625, %v946_v49 }
 0x3a9   : > { %v1497_v1 = vpack.c.bf16 %v1134_v37, %v1133_v33  ;;  %1867 = vrsqrt.f32 %v1040_v57  ;;  %v1006_v11 = vsub.f32 %v974_v62, %v990_v25  ;;  %v1030_v25 = vsub.f32 %v2718_v9, %v2821_v52 }
 0x3aa   : > { %1869 = vrsqrt.f32 %v1039_v58  ;;  %v1005_v60 = vsub.f32 %v973_v0, %v989_v63  ;;  %v964_v55 = vpop.xlane.xlu1 %963  ;;  %v1032_v9 = vsub.f32 %v2706_v5, %v2829_v10 }
 0x3ab   : > { %v962_v15 = vpop.xlane.xlu0 %961  ;;  %1517 = vst [vmem:[%s2638_s21 + $0x20] sm:$0xff] %v1497_v1   ;;  %v1038_v18 = vadd.f32 1e-05, %v1006_v11  ;;  %v982_v44 = vmul.f32 0.015625, %v964_v55 }
 0x3ac   : > { %v981_v50 = vmul.f32 0.015625, %v962_v15  ;;  %v1037_v46 = vadd.f32 1e-05, %v1005_v60 }
 0x3ad   : > { %1871 = vrsqrt.f32 %v1038_v18  ;;  %v1014_v20 = vsub.f32 %v982_v44, %v998_v13 }
 0x3ae   : > { %v1013_v21 = vsub.f32 %v981_v50, %v997_v16  ;;  %1873 = vrsqrt.f32 %v1037_v46  ;;  %v968_v56 = vpop.xlane.xlu1 %967 }
 0x3af   : > { %v966_v61 = vpop.xlane.xlu0 %965  ;;  %v1046_v23 = vadd.f32 1e-05, %v1014_v20  ;;  %v984_v27 = vmul.f32 0.015625, %v968_v56 }
 0x3b0   : > { %v1045_v26 = vadd.f32 1e-05, %v1013_v21  ;;  %v983_v28 = vmul.f32 0.015625, %v966_v61 }
 0x3b1   : > { %1875 = vrsqrt.f32 %v1046_v23  ;;  %v1016_v30 = vsub.f32 %v984_v27, %v1000_v51 }
 0x3b2   : > { %v1015_v36 = vsub.f32 %v983_v28, %v999_v22  ;;  %1877 = vrsqrt.f32 %v1045_v26 }
 0x3b3   : > { %v1868_v48 = vpop.eup %1867  ;;  %v1048_v32 = vadd.f32 1e-05, %v1016_v30 }
 0x3b4   : > { %v1047_v34 = vadd.f32 1e-05, %v1015_v36  ;;  %v1870_v35 = vpop.eup %1869  ;;  %v1072_v39 = vmul.f32 %v1868_v48, %v1024_v24 }
 0x3b5   : > { %v1071_v40 = vmul.f32 %v1870_v35, %v1023_v31  ;;  %1879 = vrsqrt.f32 %v1048_v32 }
 0x3b6   : > { %v1094_v43 = vmul.f32 %v2767_v17, %v1072_v39  ;;  %1881 = vrsqrt.f32 %v1047_v34 }
 0x3b7   : > { %v1872_v45 = vpop.eup %1871  ;;  %v1093_v14 = vmul.f32 %v2767_v17, %v1071_v40 }
 0x3b8   : > { %v1874_v29 = vpop.eup %1873  ;;  %v1116_v2 = vadd.f32 %v2774_v38, %v1094_v43  ;;  %v1070_v19 = vmul.f32 %v1872_v45, %v1022_v41 }
 0x3b9   : > { %v1115_v47 = vadd.f32 %v2774_v38, %v1093_v14  ;;  %v1069_v37 = vmul.f32 %v1874_v29, %v1021_v3 }
 0x3ba   : > { %v1132_v7 = vmax.f32 %v1116_v2, 0.0  ;;  %v1092_v59 = vmul.f32 %v2767_v17, %v1070_v19 }
 0x3bb   : > { %v1876_v54 = vpop.eup %1875  ;;  %v1131_v42 = vmax.f32 %v1115_v47, 0.0  ;;  %v1091_v49 = vmul.f32 %v2767_v17, %v1069_v37 }
 0x3bc   : > { %v1878_v33 = vpop.eup %1877  ;;  %v1114_v57 = vadd.f32 %v2774_v38, %v1092_v59  ;;  %v1078_v58 = vmul.f32 %v1876_v54, %v1030_v25 }
 0x3bd   : > { %v1492_v62 = vpack.c.bf16 %v1132_v7, %v1131_v42  ;;  %v1113_v63 = vadd.f32 %v2774_v38, %v1091_v49  ;;  %v1077_v0 = vmul.f32 %v1878_v33, %v1029_v6 }
 0x3be   : > { %v1130_v52 = vmax.f32 %v1114_v57, 0.0  ;;  %v1100_v1 = vmul.f32 %v2767_v17, %v1078_v58 }
 0x3bf   : > { %v1880_v11 = vpop.eup %1879  ;;  %1516 = vst [vmem:[%s2638_s21 + $0x18] sm:$0xff] %v1492_v62   ;;  %v1129_v53 = vmax.f32 %v1113_v63, 0.0  ;;  %v1099_v13 = vmul.f32 %v2767_v17, %v1077_v0 }
 0x3c0   : > { %v1882_v60 = vpop.eup %1881  ;;  %v1122_v55 = vadd.f32 %v2774_v38, %v1100_v1  ;;  %v1080_v15 = vmul.f32 %v1880_v11, %v1032_v9 }
 0x3c1   : > { %v1487_v16 = vpack.c.bf16 %v1130_v52, %v1129_v53  ;;  %v1121_v5 = vadd.f32 %v2774_v38, %v1099_v13  ;;  %v1079_v10 = vmul.f32 %v1882_v60, %v1031_v8 }
 0x3c2   : > { %v1138_v18 = vmax.f32 %v1122_v55, 0.0  ;;  %v1102_v44 = vmul.f32 %v2767_v17, %v1080_v15 }
 0x3c3   : > { %1515 = vst [vmem:[%s2638_s21 + $0x10] sm:$0xff] %v1487_v16   ;;  %v1137_v50 = vmax.f32 %v1121_v5, 0.0  ;;  %v1101_v4 = vmul.f32 %v2767_v17, %v1079_v10 }
 0x3c4   : > { %v1124_v12 = vadd.f32 %v2774_v38, %v1102_v44 }
 0x3c5   : > { %v1507_v46 = vpack.c.bf16 %v1138_v18, %v1137_v50  ;;  %v1123_v20 = vadd.f32 %v2774_v38, %v1101_v4 }
 0x3c6   : > { %v1140_v21 = vmax.f32 %v1124_v12, 0.0 }
 0x3c7   : > { %1519 = vst [vmem:[%s2638_s21 + $0x30] sm:$0xff] %v1507_v46   ;;  %v1139_v51 = vmax.f32 %v1123_v20, 0.0 }
 0x3c9   : > { %v1512_v22 = vpack.c.bf16 %v1140_v21, %v1139_v51 }
 0x3cb   : > { %1520 = vst [vmem:[%s2638_s21 + $0x38] sm:$0xff] %v1512_v22  }
 0x3cc PF: > { %s3042_s6 = sld [smem:[#allocation24_spill]]  ;;  %s3044_s19 = sld [smem:[#allocation27_spill]] }
 0x3cd   : > { %s3045_s5 = sld [smem:[#allocation34_spill]]  ;;  %s1235_s3 = sshll.u32 %s2638_s21, 4  ;;  %s2886_s3 = int_to_ptr.vmem [resolvable:$true] %s1235_s3 }
 0x3ce   : > { %s2890_s17 = scalar_lea.sflag [#allocation5], %s375_s18  ;;  %s2055_s11 = scalar_lea.vmem %s2886_s3, 1024 }
 0x3cf   : > { %p2056_p13 = scmp.ne.s32.totalorder %s2886_s3, %s2055_s11  ;;  %s2229_s13 = smov [#allocation14]  }
 0x3d0   : > { %s2059_s7 = sshll.u32 %s2229_s13, 4  ;;  %s2060_s7 = int_to_ptr.vmem [resolvable:$false] %s2059_s7 }
 0x3d1   : > { %s2061_s2 = scalar_lea.vmem %s2060_s7, 2048  ;;  %p2062_p3 = scmp.lt.s32.totalorder %s2886_s3, %s2060_s7 }
 0x3d2   : > { %s1473_s24 = sshll.u32 %s3042_s6, 10  ;;  %p3046_p9 = scmp.ne.s32.totalorder %s3044_s19, 0 }
 0x3d3   : > { %s2883_s16 = scalar_lea.hbm %s3045_s5, %s1473_s24  ;;  %p2063_p6 = scmp.lt.s32.totalorder %s2061_s2, %s2055_s11 }
 0x3d4   : > { %p2057_p11 = pnand %p2056_p13, %p3046_p9 }
 0x3d5   : > { %p2064_p5 = por %p2063_p6, %p2062_p3 }
 0x3d6   : > { %p2058_p8 = pneg %p2057_p11 }
 0x3d8   : > { %p2065_p1 = pnand %p2064_p5, %p2058_p8 }
 0x3da   : > { %2068 = shalt.err (!%p2065_p1)
}
 0x3db   : > { %s2069_s18 = scalar_lea.hbm %s2883_s16, 1024  ;;  %s2073_s6 = scalar_lea.hbm %s3045_s5, 2048 }
 0x3dc   : > { %p2070_p2 = scmp.ne.s32.totalorder %s2883_s16, %s2069_s18  ;;  %p2074_p10 = scmp.lt.u32.totalorder %s2883_s16, %s3045_s5 }
 0x3dd   : > { %p2075_p7 = scmp.lt.u32.totalorder %s2073_s6, %s2069_s18  ;;  %p2077_p13 = scmp.lt.u32.totalorder %s2069_s18, %s2883_s16 }
 0x3de   : > { %p2071_p4 = pnand %p2070_p2, %p3046_p9 }
 0x3df   : > { %p2076_p0 = por %p2075_p7, %p2074_p10 }
 0x3e0   : > { %p2072_p12 = pneg %p2071_p4 }
 0x3e1   : > { %p2078_p11 = por %p2077_p13, %p2076_p0 }
 0x3e3   : > { %p2079_p8 = pnand %p2078_p11, %p2072_p12 }
 0x3e5   : > { %2082 = shalt.err (!%p2079_p8)
}
 0x3e6   : > { %s2230_s15 = smov 64   ;;  %s2231_s22 = smov 4  }
 0x3e7   : > { %1669 = dma.vmem_to_hbm [thread:$0]  (%p3046_p9), %s2886_s3, 1024, %s2883_s16, %s2890_s17, %s2230_s15, %s2230_s15, %s2231_s22  }
 0x3e8 PF: > { %s3047_s11 = sld [smem:[#allocation21_spill]]  ;;  %s3048_s13 = sld [smem:[#allocation28_spill]] }
 0x3e9   : > { %p1704_p3 = scmp.ge.s32.totalorder %s2217_s10, 2 }
 0x3ee   : > { %s1250_s7 = sand.u32 1, %s3047_s11   ;;  %p3049_p6 = scmp.ne.s32.totalorder %s3048_s13, 0 }
 0x3ef   : > { %s1251_s2 = scalar_lea.sflag [#allocation5], %s1250_s7 }
 0x3f0   : > { %p1692_p5 = pnand %p1704_p3, %p3049_p6 }
 0x3f2   : > { %2160 = dma.done.wait (!%p1692_p5), %s1251_s2, 1024  }
 0x3f3   : > { %2162 = vsyncadd (!%p1692_p5), %s1251_s2, 4294966272  ;;  %s27_s10 = sadd.s32 1, %s2217_s10   ;;  %s3051_s21 = sld [smem:[#allocation22_spill]] }
 0x3f4   : > { %p2919_p1 = scmp.ge.s32.totalorder %s27_s10, 6   ;;  %s3052_s19 = smov %s2500_s27 }
 0x3f5   : > { %s3053_s16 = sld [smem:[#allocation29_spill]]  ;;  %s3054_s22 = smov %s2173_s23 }
 0x3f6   : > { %s3055_s23 = smov %s2497_s30  ;;  %s3056_s24 = smov %s2181_s25 }
 0x3f7   : > { %s3057_s25 = smov %s2185_s26  ;;  %s3058_s26 = smov %s2555_s14 }
 0x3f8   : > { %s3059_s27 = smov %s2193_s28  ;;  %s3060_s28 = smov %s2197_s29 }
 0x3f9   : > { %s3061_s29 = smov %s3052_s19  ;;  %s3062_s30 = smov %s2209_s8 }
 0x3fa   : > { %s3063_s7 = smov %s2213_s9  ;;  %s3065_s9 = smov %s3071_s20 }
 0x3fb   : > { %s3064_s8 = smov %s3053_s16  ;;  %26 = sbr.rel (!%p2919_p1) target bundleno = 20 (0x14), region = 126 }
 0x402   :  { %1256 = vsyncpa [#allocation4], 1 }
 0x403   :  { %1258 = vsyncpa [#allocation4 + $0x1], 1 }
 0x404   :  { %1259 = vsyncpa [#allocation7], 1 }
 0x405   :  { %1261 = vsyncpa [#allocation7 + $0x1], 1 }
 0x406   :  { %1262 = vsyncpa [#allocation10], 1 }
 0x407   :  { %1263 = vsyncpa [#allocation13], 1 }
 0x408   :  { %1264 = vsyncpa [#allocation5], 1 }
 0x409   :  { %1266 = vsyncpa [#allocation5 + $0x1], 1 }

</bundles_post_ra>
